<compile_context>
chip_gen: v6e
topology: v6e:2x2x1
jax: 0.10.0
libtpu: 0.0.40
codegen_flags: <defaults>
</compile_context>

<pallas_src>
import functools

import jax
import jax.numpy as jnp
from jax.experimental import pallas as pl
from jax.experimental.pallas import tpu as pltpu

BETA = 0.9
THRESH = 1.0
HIDDEN = 32


def _rleaky_chunk_kernel(x_ref, w_ref, b_ref, spk_out_ref, mem_out_ref,
                         spk_st, mem_st, *,
                         t_block, b_block, n_block, feat, matmul_dtype):
    """One grid step = b_block batch rows x n_block N-rows x t_block timesteps.

    x_ref:        (b_block, t_block, n_block, F)  input chunk (native BTNF layout)
    w_ref:        (F, F)   W' = W^T - thresh*I, VMEM-resident (constant index_map)
    b_ref:        (1, F)   bias, VMEM-resident
    spk/mem_out:  (b_block, t_block, n_block, F)  output trace chunks
    spk/mem_st:   (b_block*n_block, F) f32 VMEM   recurrent state across time chunks
    """
    tc = pl.program_id(2)                 # time-chunk index (innermost, "arbitrary")
    rows = b_block * n_block

    # init_rleaky(): zero state at the start of every row-group's time sweep.
    # Correct because the time axis is the innermost grid dim: tc wraps to 0
    # whenever the (batch-group, n-group) parallel indices advance.
    @pl.when(tc == 0)
    def _():
        spk_st[...] = jnp.zeros_like(spk_st)
        mem_st[...] = jnp.zeros_like(mem_st)

    w = w_ref[...]                        # (F, F), reset already fused in
    # bias broadcast hoisted out of the time loop (broadcast_in_dim is not CSE'd)
    bias_full = jnp.broadcast_to(b_ref[...].astype(jnp.float32), (rows, feat))

    spk = spk_st[...]
    mem = mem_st[...]

    # Static, fully unrolled time loop (t_block <= 32); per-step work is one small
    # MXU push plus a handful of VPU ops, so straight-line code is ideal.
    for tl in range(t_block):
        parts = [x_ref[bb, tl].astype(jnp.float32) for bb in range(b_block)]
        x_t = parts[0] if b_block == 1 else jnp.concatenate(parts, axis=0)  # (rows,F)
        # recurrent linear with fused subtract-reset: spk@W^T + b - thresh*spk
        rec = jnp.dot(spk.astype(matmul_dtype), w,
                      preferred_element_type=jnp.float32)
        mem = BETA * mem + x_t + rec + bias_full
        spk = (mem > THRESH).astype(jnp.float32)            # Heaviside forward
        spk_o = spk.astype(spk_out_ref.dtype)
        mem_o = mem.astype(mem_out_ref.dtype)
        for bb in range(b_block):
            rs = slice(bb * n_block, (bb + 1) * n_block)
            spk_out_ref[bb, tl] = spk_o[rs]
            mem_out_ref[bb, tl] = mem_o[rs]

    # carry recurrent state to the next time chunk
    spk_st[...] = spk
    mem_st[...] = mem


def temporal_spike(x, w, bias, *, return_last=False, t_block=32, b_block=None,
                   n_block=None, out_dtype=jnp.float32, matmul_dtype=jnp.float32):
    """x: (B, T, N, F), f32 or bf16. w: (F, F) = nn.Linear weight (out, in). bias: (F,).

    out_dtype=jnp.bfloat16 halves the HBM-bound output-trace traffic; matmul_dtype=
    jnp.bfloat16 uses MXU-native operands on v6e/v7x (spikes are exactly 0/1 in bf16,
    weights pick up ~1e-3 relative rounding). Defaults keep full f32 semantics.
    """
    B, T, N, F = x.shape

    # ---- time chunking: even chunks with minimal zero padding (never collapses to
    # t_block=1 for prime T); padded steps are computed then sliced away. ----
    t_req = max(1, min(int(t_block), T))
    num_chunks = pl.cdiv(T, t_req)
    tb = pl.cdiv(T, num_chunks)
    T_pad = tb * num_chunks
    if T_pad != T:
        x = jnp.pad(x, ((0, 0), (0, T_pad - T), (0, 0), (0, 0)))

    # ---- row grouping: fold several independent recurrences into one tile ----
    if b_block is None:
        target = max(1, 64 // max(N, 1))      # aim for ~64 state rows per grid step
        b_block = max(d for d in range(1, min(B, target) + 1) if B % d == 0)
    assert B % b_block == 0, "b_block must divide B"
    if n_block is None:
        n_block = N                            # set < N to feed v7x's 2nd core at tiny B
    assert N % n_block == 0, "n_block must divide N"
    rows = b_block * n_block

    # ---- fold the subtract-reset into the recurrent weight: W' = W^T - thresh*I ----
    w_fold = (jnp.transpose(w).astype(jnp.float32)
              - THRESH * jnp.eye(F, dtype=jnp.float32)).astype(matmul_dtype)
    bias2d = bias.reshape(1, F).astype(jnp.float32)

    kernel = functools.partial(_rleaky_chunk_kernel, t_block=tb, b_block=b_block,
                               n_block=n_block, feat=F, matmul_dtype=matmul_dtype)

    trace_shape = jax.ShapeDtypeStruct((B, T_pad, N, F), out_dtype)
    io_block = (b_block, tb, n_block, F)
    io_map = lambda bg, ng, tc: (bg, tc, ng, 0)

    spikes, mems = pl.pallas_call(
        kernel,
        out_shape=(trace_shape, trace_shape),
        grid_spec=pltpu.PrefetchScalarGridSpec(
            num_scalar_prefetch=0,
            # NOTE: time must remain the innermost ("arbitrary") grid dimension;
            # the VMEM state carry + tc==0 reset rely on this ordering.
            grid=(B // b_block, N // n_block, num_chunks),
            in_specs=[
                pl.BlockSpec(io_block, io_map),                     # x, native BTNF
                pl.BlockSpec((F, F), lambda bg, ng, tc: (0, 0)),    # W' VMEM-resident
                pl.BlockSpec((1, F), lambda bg, ng, tc: (0, 0)),    # bias VMEM-resident
            ],
            out_specs=[pl.BlockSpec(io_block, io_map),
                       pl.BlockSpec(io_block, io_map)],
            scratch_shapes=[pltpu.VMEM((rows, F), jnp.float32),     # spike state
                            pltpu.VMEM((rows, F), jnp.float32)],    # membrane state
        ),
        compiler_params=pltpu.CompilerParams(
            dimension_semantics=("parallel", "parallel", "arbitrary")),
    )(x, w_fold, bias2d)

    if T_pad != T:
        spikes, mems = spikes[:, :T], mems[:, :T]
    if return_last:
        return spikes[:, -1], mems[:, -1]
    return spikes, mems


def temporal_spike_ref(x, w, bias):
    """Pure-JAX reference (lax.scan over time) for correctness check."""
    B, T, N, F = x.shape
    x_t_first = jnp.transpose(x, (1, 0, 2, 3)).astype(jnp.float32)  # (T,B,N,F)
    w_t = jnp.transpose(w).astype(jnp.float32)
    b = bias.astype(jnp.float32)

    def step(carry, x_t):
        spk, mem = carry
        rec = jnp.einsum('bnf,fg->bng', spk, w_t,
                         preferred_element_type=jnp.float32) + b
        mem_new = BETA * mem + x_t + rec - spk * THRESH
        spk_new = (mem_new > THRESH).astype(jnp.float32)
        return (spk_new, mem_new), (spk_new, mem_new)

    init = (jnp.zeros((B, N, F), jnp.float32), jnp.zeros((B, N, F), jnp.float32))
    _, (spikes, mems) = jax.lax.scan(step, init, x_t_first)
    return spikes.transpose(1, 0, 2, 3), mems.transpose(1, 0, 2, 3)


if __name__ == "__main__":
    B, T, N, F = 2, 8, 16, HIDDEN

    key = jax.random.PRNGKey(0)
    kx, kw, kb = jax.random.split(key, 3)

    # deterministic inputs / parameters (PyTorch Linear-style uniform init bound)
    x = 1.5 * jax.random.normal(kx, (B, T, N, F), dtype=jnp.float32)
    bound = 1.0 / (F ** 0.5)
    w = jax.random.uniform(kw, (F, F), minval=-bound, maxval=bound, dtype=jnp.float32)
    bias = jax.random.uniform(kb, (F,), minval=-bound, maxval=bound, dtype=jnp.float32)

    spikes, mems = temporal_spike(x, w, bias, return_last=False)
    jax.block_until_ready((spikes, mems))

    spikes_ref, mems_ref = temporal_spike_ref(x, w, bias)
    assert spikes.shape == (B, T, N, F) and mems.shape == (B, T, N, F)

    # kernel-internal consistency (f32 traces): spikes are exactly the thresholded mems
    assert bool(jnp.array_equal(spikes, (mems > THRESH).astype(spikes.dtype)))
    # membranes: tolerance for fp / matmul-order differences vs XLA einsum
    assert jnp.allclose(mems, mems_ref, atol=5e-3), "membrane mismatch"
    # spikes: hard threshold -> tiny mismatch budget for near-threshold flips
    mismatch = float(jnp.mean((spikes != spikes_ref).astype(jnp.float32)))
    assert mismatch < 5e-3, f"spike mismatch fraction {mismatch}"

    print("KERNEL_OK")
</pallas_src>

<mosaic_0001>
module attributes {stable_mosaic.version = 11 : i64} {
  func.func @_rleaky_chunk_kernel(%arg0: i32, %arg1: i32, %arg2: i32, %arg3: memref<2x8x16x32xf32, #tpu.memory_space<vmem>>, %arg4: memref<32x32xf32, #tpu.memory_space<vmem>>, %arg5: memref<1x32xf32, #tpu.memory_space<vmem>>, %arg6: memref<2x8x16x32xf32, #tpu.memory_space<vmem>>, %arg7: memref<2x8x16x32xf32, #tpu.memory_space<vmem>>, %arg8: memref<32x32xf32, #tpu.memory_space<vmem>>, %arg9: memref<32x32xf32, #tpu.memory_space<vmem>>) attributes {dimension_semantics = [#tpu.dimension_semantics<parallel>, #tpu.dimension_semantics<parallel>, #tpu.dimension_semantics<arbitrary>], iteration_bounds = array<i64: 1, 1, 1>, scalar_prefetch = 0 : i64, scratch_operands = 2 : i64, tpu.core_type = #tpu.core_type<tc>, window_params = [{transform_indices = @transform_0, window_bounds = array<i64: 2, 8, 16, 32>}, {pipeline_mode = #tpu.pipeline_mode<synchronous>, transform_indices = @transform_1, window_bounds = array<i64: 32, 32>}, {pipeline_mode = #tpu.pipeline_mode<synchronous>, transform_indices = @transform_2, window_bounds = array<i64: 1, 32>}, {transform_indices = @transform_3, window_bounds = array<i64: 2, 8, 16, 32>}, {transform_indices = @transform_4, window_bounds = array<i64: 2, 8, 16, 32>}]} {
    %c0_i32 = arith.constant 0 : i32
    %0 = arith.cmpi eq, %arg2, %c0_i32 : i32
    %1 = arith.extui %0 : i1 to i32
    %c0_i32_0 = arith.constant 0 : i32
    %2 = arith.cmpi ne, %1, %c0_i32_0 : i32
    scf.if %2 {
      %cst_220 = arith.constant 0.000000e+00 : f32
      %259 = vector.broadcast %cst_220 : f32 to vector<32x32xf32>
      %c0_221 = arith.constant 0 : index
      %c0_222 = arith.constant 0 : index
      %260 = vector.load %arg8[%c0_221, %c0_222] : memref<32x32xf32, #tpu.memory_space<vmem>>, vector<32x32xf32>
      tpu.vector_store %arg8[%c0_221, %c0_222], %259 {strides = array<i32>} : memref<32x32xf32, #tpu.memory_space<vmem>>, vector<32x32xf32>,
      %cst_223 = arith.constant 0.000000e+00 : f32
      %261 = vector.broadcast %cst_223 : f32 to vector<32x32xf32>
      %c0_224 = arith.constant 0 : index
      %c0_225 = arith.constant 0 : index
      %262 = vector.load %arg9[%c0_224, %c0_225] : memref<32x32xf32, #tpu.memory_space<vmem>>, vector<32x32xf32>
      tpu.vector_store %arg9[%c0_224, %c0_225], %261 {strides = array<i32>} : memref<32x32xf32, #tpu.memory_space<vmem>>, vector<32x32xf32>,
    } else {
    }
    %c0 = arith.constant 0 : index
    %c0_1 = arith.constant 0 : index
    %3 = vector.load %arg4[%c0, %c0_1] : memref<32x32xf32, #tpu.memory_space<vmem>>, vector<32x32xf32>
    %c0_2 = arith.constant 0 : index
    %c0_3 = arith.constant 0 : index
    %4 = vector.load %arg5[%c0_2, %c0_3] : memref<1x32xf32, #tpu.memory_space<vmem>>, vector<1x32xf32>
    %5 = vector.shape_cast %4 : vector<1x32xf32> to vector<1x32xf32>
    %6 = vector.broadcast %5 : vector<1x32xf32> to vector<32x32xf32>
    %c0_4 = arith.constant 0 : index
    %c0_5 = arith.constant 0 : index
    %7 = vector.load %arg8[%c0_4, %c0_5] : memref<32x32xf32, #tpu.memory_space<vmem>>, vector<32x32xf32>
    %c0_6 = arith.constant 0 : index
    %c0_7 = arith.constant 0 : index
    %8 = vector.load %arg9[%c0_6, %c0_7] : memref<32x32xf32, #tpu.memory_space<vmem>>, vector<32x32xf32>
    %c0_8 = arith.constant 0 : index
    %c0_9 = arith.constant 0 : index
    %c0_10 = arith.constant 0 : index
    %c0_11 = arith.constant 0 : index
    %9 = vector.load %arg3[%c0_8, %c0_9, %c0_10, %c0_11] : memref<2x8x16x32xf32, #tpu.memory_space<vmem>>, vector<1x1x16x32xf32>
    %10 = vector.shape_cast %9 : vector<1x1x16x32xf32> to vector<16x32xf32>
    %c1 = arith.constant 1 : index
    %c0_12 = arith.constant 0 : index
    %c0_13 = arith.constant 0 : index
    %c0_14 = arith.constant 0 : index
    %11 = vector.load %arg3[%c1, %c0_12, %c0_13, %c0_14] : memref<2x8x16x32xf32, #tpu.memory_space<vmem>>, vector<1x1x16x32xf32>
    %12 = vector.shape_cast %11 : vector<1x1x16x32xf32> to vector<16x32xf32>
    %13 = tpu.concatenate %10, %12 in 0 : vector<16x32xf32>, vector<16x32xf32> -> vector<32x32xf32>
    %cst = arith.constant dense<0.000000e+00> : vector<32x32xf32>
    %14 = tpu.matmul %7, %3, %cst {dimension_numbers = #tpu.dot_dimension_numbers<[1], [0], [0], [1], [0, 0, 1, 1], [], []>} : vector<32x32xf32>, vector<32x32xf32>, vector<32x32xf32> -> vector<32x32xf32>
    %cst_15 = arith.constant 0.899999976 : f32
    %15 = vector.broadcast %cst_15 : f32 to vector<32x32xf32>
    %16 = arith.mulf %15, %8 : vector<32x32xf32>
    %17 = arith.addf %16, %13 : vector<32x32xf32>
    %18 = arith.addf %17, %14 : vector<32x32xf32>
    %19 = arith.addf %18, %6 : vector<32x32xf32>
    %cst_16 = arith.constant 1.000000e+00 : f32
    %20 = vector.broadcast %cst_16 : f32 to vector<32x32xf32>
    %21 = arith.cmpf ogt, %19, %20 : vector<32x32xf32>
    %22 = arith.extui %21 : vector<32x32xi1> to vector<32x32xi32>
    %23 = arith.sitofp %22 : vector<32x32xi32> to vector<32x32xf32>
    %24 = vector.extract_strided_slice %23 {offsets = [0, 0], sizes = [16, 32], strides = [1, 1]} : vector<32x32xf32> to vector<16x32xf32>
    %c0_17 = arith.constant 0 : index
    %c0_18 = arith.constant 0 : index
    %c0_19 = arith.constant 0 : index
    %c0_20 = arith.constant 0 : index
    %25 = vector.load %arg6[%c0_17, %c0_18, %c0_19, %c0_20] : memref<2x8x16x32xf32, #tpu.memory_space<vmem>>, vector<1x1x16x32xf32>
    %26 = vector.shape_cast %25 : vector<1x1x16x32xf32> to vector<16x32xf32>
    %27 = vector.shape_cast %24 : vector<16x32xf32> to vector<1x1x16x32xf32>
    tpu.vector_store %arg6[%c0_17, %c0_18, %c0_19, %c0_20], %27 {strides = array<i32>} : memref<2x8x16x32xf32, #tpu.memory_space<vmem>>, vector<1x1x16x32xf32>,
    %28 = vector.extract_strided_slice %19 {offsets = [0, 0], sizes = [16, 32], strides = [1, 1]} : vector<32x32xf32> to vector<16x32xf32>
    %c0_21 = arith.constant 0 : index
    %c0_22 = arith.constant 0 : index
    %c0_23 = arith.constant 0 : index
    %c0_24 = arith.constant 0 : index
    %29 = vector.load %arg7[%c0_21, %c0_22, %c0_23, %c0_24] : memref<2x8x16x32xf32, #tpu.memory_space<vmem>>, vector<1x1x16x32xf32>
    %30 = vector.shape_cast %29 : vector<1x1x16x32xf32> to vector<16x32xf32>
    %31 = vector.shape_cast %28 : vector<16x32xf32> to vector<1x1x16x32xf32>
    tpu.vector_store %arg7[%c0_21, %c0_22, %c0_23, %c0_24], %31 {strides = array<i32>} : memref<2x8x16x32xf32, #tpu.memory_space<vmem>>, vector<1x1x16x32xf32>,
    %32 = vector.extract_strided_slice %23 {offsets = [16, 0], sizes = [16, 32], strides = [1, 1]} : vector<32x32xf32> to vector<16x32xf32>
    %c1_25 = arith.constant 1 : index
    %c0_26 = arith.constant 0 : index
    %c0_27 = arith.constant 0 : index
    %c0_28 = arith.constant 0 : index
    %33 = vector.load %arg6[%c1_25, %c0_26, %c0_27, %c0_28] : memref<2x8x16x32xf32, #tpu.memory_space<vmem>>, vector<1x1x16x32xf32>
    %34 = vector.shape_cast %33 : vector<1x1x16x32xf32> to vector<16x32xf32>
    %35 = vector.shape_cast %32 : vector<16x32xf32> to vector<1x1x16x32xf32>
    tpu.vector_store %arg6[%c1_25, %c0_26, %c0_27, %c0_28], %35 {strides = array<i32>} : memref<2x8x16x32xf32, #tpu.memory_space<vmem>>, vector<1x1x16x32xf32>,
    %36 = vector.extract_strided_slice %19 {offsets = [16, 0], sizes = [16, 32], strides = [1, 1]} : vector<32x32xf32> to vector<16x32xf32>
    %c1_29 = arith.constant 1 : index
    %c0_30 = arith.constant 0 : index
    %c0_31 = arith.constant 0 : index
    %c0_32 = arith.constant 0 : index
    %37 = vector.load %arg7[%c1_29, %c0_30, %c0_31, %c0_32] : memref<2x8x16x32xf32, #tpu.memory_space<vmem>>, vector<1x1x16x32xf32>
    %38 = vector.shape_cast %37 : vector<1x1x16x32xf32> to vector<16x32xf32>
    %39 = vector.shape_cast %36 : vector<16x32xf32> to vector<1x1x16x32xf32>
    tpu.vector_store %arg7[%c1_29, %c0_30, %c0_31, %c0_32], %39 {strides = array<i32>} : memref<2x8x16x32xf32, #tpu.memory_space<vmem>>, vector<1x1x16x32xf32>,
    %c0_33 = arith.constant 0 : index
    %c1_34 = arith.constant 1 : index
    %c0_35 = arith.constant 0 : index
    %c0_36 = arith.constant 0 : index
    %40 = vector.load %arg3[%c0_33, %c1_34, %c0_35, %c0_36] : memref<2x8x16x32xf32, #tpu.memory_space<vmem>>, vector<1x1x16x32xf32>
    %41 = vector.shape_cast %40 : vector<1x1x16x32xf32> to vector<16x32xf32>
    %c1_37 = arith.constant 1 : index
    %c1_38 = arith.constant 1 : index
    %c0_39 = arith.constant 0 : index
    %c0_40 = arith.constant 0 : index
    %42 = vector.load %arg3[%c1_37, %c1_38, %c0_39, %c0_40] : memref<2x8x16x32xf32, #tpu.memory_space<vmem>>, vector<1x1x16x32xf32>
    %43 = vector.shape_cast %42 : vector<1x1x16x32xf32> to vector<16x32xf32>
    %44 = tpu.concatenate %41, %43 in 0 : vector<16x32xf32>, vector<16x32xf32> -> vector<32x32xf32>
    %cst_41 = arith.constant dense<0.000000e+00> : vector<32x32xf32>
    %45 = tpu.matmul %23, %3, %cst_41 {dimension_numbers = #tpu.dot_dimension_numbers<[1], [0], [0], [1], [0, 0, 1, 1], [], []>} : vector<32x32xf32>, vector<32x32xf32>, vector<32x32xf32> -> vector<32x32xf32>
    %cst_42 = arith.constant 0.899999976 : f32
    %46 = vector.broadcast %cst_42 : f32 to vector<32x32xf32>
    %47 = arith.mulf %46, %19 : vector<32x32xf32>
    %48 = arith.addf %47, %44 : vector<32x32xf32>
    %49 = arith.addf %48, %45 : vector<32x32xf32>
    %50 = arith.addf %49, %6 : vector<32x32xf32>
    %cst_43 = arith.constant 1.000000e+00 : f32
    %51 = vector.broadcast %cst_43 : f32 to vector<32x32xf32>
    %52 = arith.cmpf ogt, %50, %51 : vector<32x32xf32>
    %53 = arith.extui %52 : vector<32x32xi1> to vector<32x32xi32>
    %54 = arith.sitofp %53 : vector<32x32xi32> to vector<32x32xf32>
    %55 = vector.extract_strided_slice %54 {offsets = [0, 0], sizes = [16, 32], strides = [1, 1]} : vector<32x32xf32> to vector<16x32xf32>
    %c0_44 = arith.constant 0 : index
    %c1_45 = arith.constant 1 : index
    %c0_46 = arith.constant 0 : index
    %c0_47 = arith.constant 0 : index
    %56 = vector.load %arg6[%c0_44, %c1_45, %c0_46, %c0_47] : memref<2x8x16x32xf32, #tpu.memory_space<vmem>>, vector<1x1x16x32xf32>
    %57 = vector.shape_cast %56 : vector<1x1x16x32xf32> to vector<16x32xf32>
    %58 = vector.shape_cast %55 : vector<16x32xf32> to vector<1x1x16x32xf32>
    tpu.vector_store %arg6[%c0_44, %c1_45, %c0_46, %c0_47], %58 {strides = array<i32>} : memref<2x8x16x32xf32, #tpu.memory_space<vmem>>, vector<1x1x16x32xf32>,
    %59 = vector.extract_strided_slice %50 {offsets = [0, 0], sizes = [16, 32], strides = [1, 1]} : vector<32x32xf32> to vector<16x32xf32>
    %c0_48 = arith.constant 0 : index
    %c1_49 = arith.constant 1 : index
    %c0_50 = arith.constant 0 : index
    %c0_51 = arith.constant 0 : index
    %60 = vector.load %arg7[%c0_48, %c1_49, %c0_50, %c0_51] : memref<2x8x16x32xf32, #tpu.memory_space<vmem>>, vector<1x1x16x32xf32>
    %61 = vector.shape_cast %60 : vector<1x1x16x32xf32> to vector<16x32xf32>
    %62 = vector.shape_cast %59 : vector<16x32xf32> to vector<1x1x16x32xf32>
    tpu.vector_store %arg7[%c0_48, %c1_49, %c0_50, %c0_51], %62 {strides = array<i32>} : memref<2x8x16x32xf32, #tpu.memory_space<vmem>>, vector<1x1x16x32xf32>,
    %63 = vector.extract_strided_slice %54 {offsets = [16, 0], sizes = [16, 32], strides = [1, 1]} : vector<32x32xf32> to vector<16x32xf32>
    %c1_52 = arith.constant 1 : index
    %c1_53 = arith.constant 1 : index
    %c0_54 = arith.constant 0 : index
    %c0_55 = arith.constant 0 : index
    %64 = vector.load %arg6[%c1_52, %c1_53, %c0_54, %c0_55] : memref<2x8x16x32xf32, #tpu.memory_space<vmem>>, vector<1x1x16x32xf32>
    %65 = vector.shape_cast %64 : vector<1x1x16x32xf32> to vector<16x32xf32>
    %66 = vector.shape_cast %63 : vector<16x32xf32> to vector<1x1x16x32xf32>
    tpu.vector_store %arg6[%c1_52, %c1_53, %c0_54, %c0_55], %66 {strides = array<i32>} : memref<2x8x16x32xf32, #tpu.memory_space<vmem>>, vector<1x1x16x32xf32>,
    %67 = vector.extract_strided_slice %50 {offsets = [16, 0], sizes = [16, 32], strides = [1, 1]} : vector<32x32xf32> to vector<16x32xf32>
    %c1_56 = arith.constant 1 : index
    %c1_57 = arith.constant 1 : index
    %c0_58 = arith.constant 0 : index
    %c0_59 = arith.constant 0 : index
    %68 = vector.load %arg7[%c1_56, %c1_57, %c0_58, %c0_59] : memref<2x8x16x32xf32, #tpu.memory_space<vmem>>, vector<1x1x16x32xf32>
    %69 = vector.shape_cast %68 : vector<1x1x16x32xf32> to vector<16x32xf32>
    %70 = vector.shape_cast %67 : vector<16x32xf32> to vector<1x1x16x32xf32>
    tpu.vector_store %arg7[%c1_56, %c1_57, %c0_58, %c0_59], %70 {strides = array<i32>} : memref<2x8x16x32xf32, #tpu.memory_space<vmem>>, vector<1x1x16x32xf32>,
    %c0_60 = arith.constant 0 : index
    %c2 = arith.constant 2 : index
    %c0_61 = arith.constant 0 : index
    %c0_62 = arith.constant 0 : index
    %71 = vector.load %arg3[%c0_60, %c2, %c0_61, %c0_62] : memref<2x8x16x32xf32, #tpu.memory_space<vmem>>, vector<1x1x16x32xf32>
    %72 = vector.shape_cast %71 : vector<1x1x16x32xf32> to vector<16x32xf32>
    %c1_63 = arith.constant 1 : index
    %c2_64 = arith.constant 2 : index
    %c0_65 = arith.constant 0 : index
    %c0_66 = arith.constant 0 : index
    %73 = vector.load %arg3[%c1_63, %c2_64, %c0_65, %c0_66] : memref<2x8x16x32xf32, #tpu.memory_space<vmem>>, vector<1x1x16x32xf32>
    %74 = vector.shape_cast %73 : vector<1x1x16x32xf32> to vector<16x32xf32>
    %75 = tpu.concatenate %72, %74 in 0 : vector<16x32xf32>, vector<16x32xf32> -> vector<32x32xf32>
    %cst_67 = arith.constant dense<0.000000e+00> : vector<32x32xf32>
    %76 = tpu.matmul %54, %3, %cst_67 {dimension_numbers = #tpu.dot_dimension_numbers<[1], [0], [0], [1], [0, 0, 1, 1], [], []>} : vector<32x32xf32>, vector<32x32xf32>, vector<32x32xf32> -> vector<32x32xf32>
    %cst_68 = arith.constant 0.899999976 : f32
    %77 = vector.broadcast %cst_68 : f32 to vector<32x32xf32>
    %78 = arith.mulf %77, %50 : vector<32x32xf32>
    %79 = arith.addf %78, %75 : vector<32x32xf32>
    %80 = arith.addf %79, %76 : vector<32x32xf32>
    %81 = arith.addf %80, %6 : vector<32x32xf32>
    %cst_69 = arith.constant 1.000000e+00 : f32
    %82 = vector.broadcast %cst_69 : f32 to vector<32x32xf32>
    %83 = arith.cmpf ogt, %81, %82 : vector<32x32xf32>
    %84 = arith.extui %83 : vector<32x32xi1> to vector<32x32xi32>
    %85 = arith.sitofp %84 : vector<32x32xi32> to vector<32x32xf32>
    %86 = vector.extract_strided_slice %85 {offsets = [0, 0], sizes = [16, 32], strides = [1, 1]} : vector<32x32xf32> to vector<16x32xf32>
    %c0_70 = arith.constant 0 : index
    %c2_71 = arith.constant 2 : index
    %c0_72 = arith.constant 0 : index
    %c0_73 = arith.constant 0 : index
    %87 = vector.load %arg6[%c0_70, %c2_71, %c0_72, %c0_73] : memref<2x8x16x32xf32, #tpu.memory_space<vmem>>, vector<1x1x16x32xf32>
    %88 = vector.shape_cast %87 : vector<1x1x16x32xf32> to vector<16x32xf32>
    %89 = vector.shape_cast %86 : vector<16x32xf32> to vector<1x1x16x32xf32>
    tpu.vector_store %arg6[%c0_70, %c2_71, %c0_72, %c0_73], %89 {strides = array<i32>} : memref<2x8x16x32xf32, #tpu.memory_space<vmem>>, vector<1x1x16x32xf32>,
    %90 = vector.extract_strided_slice %81 {offsets = [0, 0], sizes = [16, 32], strides = [1, 1]} : vector<32x32xf32> to vector<16x32xf32>
    %c0_74 = arith.constant 0 : index
    %c2_75 = arith.constant 2 : index
    %c0_76 = arith.constant 0 : index
    %c0_77 = arith.constant 0 : index
    %91 = vector.load %arg7[%c0_74, %c2_75, %c0_76, %c0_77] : memref<2x8x16x32xf32, #tpu.memory_space<vmem>>, vector<1x1x16x32xf32>
    %92 = vector.shape_cast %91 : vector<1x1x16x32xf32> to vector<16x32xf32>
    %93 = vector.shape_cast %90 : vector<16x32xf32> to vector<1x1x16x32xf32>
    tpu.vector_store %arg7[%c0_74, %c2_75, %c0_76, %c0_77], %93 {strides = array<i32>} : memref<2x8x16x32xf32, #tpu.memory_space<vmem>>, vector<1x1x16x32xf32>,
    %94 = vector.extract_strided_slice %85 {offsets = [16, 0], sizes = [16, 32], strides = [1, 1]} : vector<32x32xf32> to vector<16x32xf32>
    %c1_78 = arith.constant 1 : index
    %c2_79 = arith.constant 2 : index
    %c0_80 = arith.constant 0 : index
    %c0_81 = arith.constant 0 : index
    %95 = vector.load %arg6[%c1_78, %c2_79, %c0_80, %c0_81] : memref<2x8x16x32xf32, #tpu.memory_space<vmem>>, vector<1x1x16x32xf32>
    %96 = vector.shape_cast %95 : vector<1x1x16x32xf32> to vector<16x32xf32>
    %97 = vector.shape_cast %94 : vector<16x32xf32> to vector<1x1x16x32xf32>
    tpu.vector_store %arg6[%c1_78, %c2_79, %c0_80, %c0_81], %97 {strides = array<i32>} : memref<2x8x16x32xf32, #tpu.memory_space<vmem>>, vector<1x1x16x32xf32>,
    %98 = vector.extract_strided_slice %81 {offsets = [16, 0], sizes = [16, 32], strides = [1, 1]} : vector<32x32xf32> to vector<16x32xf32>
    %c1_82 = arith.constant 1 : index
    %c2_83 = arith.constant 2 : index
    %c0_84 = arith.constant 0 : index
    %c0_85 = arith.constant 0 : index
    %99 = vector.load %arg7[%c1_82, %c2_83, %c0_84, %c0_85] : memref<2x8x16x32xf32, #tpu.memory_space<vmem>>, vector<1x1x16x32xf32>
    %100 = vector.shape_cast %99 : vector<1x1x16x32xf32> to vector<16x32xf32>
    %101 = vector.shape_cast %98 : vector<16x32xf32> to vector<1x1x16x32xf32>
    tpu.vector_store %arg7[%c1_82, %c2_83, %c0_84, %c0_85], %101 {strides = array<i32>} : memref<2x8x16x32xf32, #tpu.memory_space<vmem>>, vector<1x1x16x32xf32>,
    %c0_86 = arith.constant 0 : index
    %c3 = arith.constant 3 : index
    %c0_87 = arith.constant 0 : index
    %c0_88 = arith.constant 0 : index
    %102 = vector.load %arg3[%c0_86, %c3, %c0_87, %c0_88] : memref<2x8x16x32xf32, #tpu.memory_space<vmem>>, vector<1x1x16x32xf32>
    %103 = vector.shape_cast %102 : vector<1x1x16x32xf32> to vector<16x32xf32>
    %c1_89 = arith.constant 1 : index
    %c3_90 = arith.constant 3 : index
    %c0_91 = arith.constant 0 : index
    %c0_92 = arith.constant 0 : index
    %104 = vector.load %arg3[%c1_89, %c3_90, %c0_91, %c0_92] : memref<2x8x16x32xf32, #tpu.memory_space<vmem>>, vector<1x1x16x32xf32>
    %105 = vector.shape_cast %104 : vector<1x1x16x32xf32> to vector<16x32xf32>
    %106 = tpu.concatenate %103, %105 in 0 : vector<16x32xf32>, vector<16x32xf32> -> vector<32x32xf32>
    %cst_93 = arith.constant dense<0.000000e+00> : vector<32x32xf32>
    %107 = tpu.matmul %85, %3, %cst_93 {dimension_numbers = #tpu.dot_dimension_numbers<[1], [0], [0], [1], [0, 0, 1, 1], [], []>} : vector<32x32xf32>, vector<32x32xf32>, vector<32x32xf32> -> vector<32x32xf32>
    %cst_94 = arith.constant 0.899999976 : f32
    %108 = vector.broadcast %cst_94 : f32 to vector<32x32xf32>
    %109 = arith.mulf %108, %81 : vector<32x32xf32>
    %110 = arith.addf %109, %106 : vector<32x32xf32>
    %111 = arith.addf %110, %107 : vector<32x32xf32>
    %112 = arith.addf %111, %6 : vector<32x32xf32>
    %cst_95 = arith.constant 1.000000e+00 : f32
    %113 = vector.broadcast %cst_95 : f32 to vector<32x32xf32>
    %114 = arith.cmpf ogt, %112, %113 : vector<32x32xf32>
    %115 = arith.extui %114 : vector<32x32xi1> to vector<32x32xi32>
    %116 = arith.sitofp %115 : vector<32x32xi32> to vector<32x32xf32>
    %117 = vector.extract_strided_slice %116 {offsets = [0, 0], sizes = [16, 32], strides = [1, 1]} : vector<32x32xf32> to vector<16x32xf32>
    %c0_96 = arith.constant 0 : index
    %c3_97 = arith.constant 3 : index
    %c0_98 = arith.constant 0 : index
    %c0_99 = arith.constant 0 : index
    %118 = vector.load %arg6[%c0_96, %c3_97, %c0_98, %c0_99] : memref<2x8x16x32xf32, #tpu.memory_space<vmem>>, vector<1x1x16x32xf32>
    %119 = vector.shape_cast %118 : vector<1x1x16x32xf32> to vector<16x32xf32>
    %120 = vector.shape_cast %117 : vector<16x32xf32> to vector<1x1x16x32xf32>
    tpu.vector_store %arg6[%c0_96, %c3_97, %c0_98, %c0_99], %120 {strides = array<i32>} : memref<2x8x16x32xf32, #tpu.memory_space<vmem>>, vector<1x1x16x32xf32>,
    %121 = vector.extract_strided_slice %112 {offsets = [0, 0], sizes = [16, 32], strides = [1, 1]} : vector<32x32xf32> to vector<16x32xf32>
    %c0_100 = arith.constant 0 : index
    %c3_101 = arith.constant 3 : index
    %c0_102 = arith.constant 0 : index
    %c0_103 = arith.constant 0 : index
    %122 = vector.load %arg7[%c0_100, %c3_101, %c0_102, %c0_103] : memref<2x8x16x32xf32, #tpu.memory_space<vmem>>, vector<1x1x16x32xf32>
    %123 = vector.shape_cast %122 : vector<1x1x16x32xf32> to vector<16x32xf32>
    %124 = vector.shape_cast %121 : vector<16x32xf32> to vector<1x1x16x32xf32>
    tpu.vector_store %arg7[%c0_100, %c3_101, %c0_102, %c0_103], %124 {strides = array<i32>} : memref<2x8x16x32xf32, #tpu.memory_space<vmem>>, vector<1x1x16x32xf32>,
    %125 = vector.extract_strided_slice %116 {offsets = [16, 0], sizes = [16, 32], strides = [1, 1]} : vector<32x32xf32> to vector<16x32xf32>
    %c1_104 = arith.constant 1 : index
    %c3_105 = arith.constant 3 : index
    %c0_106 = arith.constant 0 : index
    %c0_107 = arith.constant 0 : index
    %126 = vector.load %arg6[%c1_104, %c3_105, %c0_106, %c0_107] : memref<2x8x16x32xf32, #tpu.memory_space<vmem>>, vector<1x1x16x32xf32>
    %127 = vector.shape_cast %126 : vector<1x1x16x32xf32> to vector<16x32xf32>
    %128 = vector.shape_cast %125 : vector<16x32xf32> to vector<1x1x16x32xf32>
    tpu.vector_store %arg6[%c1_104, %c3_105, %c0_106, %c0_107], %128 {strides = array<i32>} : memref<2x8x16x32xf32, #tpu.memory_space<vmem>>, vector<1x1x16x32xf32>,
    %129 = vector.extract_strided_slice %112 {offsets = [16, 0], sizes = [16, 32], strides = [1, 1]} : vector<32x32xf32> to vector<16x32xf32>
    %c1_108 = arith.constant 1 : index
    %c3_109 = arith.constant 3 : index
    %c0_110 = arith.constant 0 : index
    %c0_111 = arith.constant 0 : index
    %130 = vector.load %arg7[%c1_108, %c3_109, %c0_110, %c0_111] : memref<2x8x16x32xf32, #tpu.memory_space<vmem>>, vector<1x1x16x32xf32>
    %131 = vector.shape_cast %130 : vector<1x1x16x32xf32> to vector<16x32xf32>
    %132 = vector.shape_cast %129 : vector<16x32xf32> to vector<1x1x16x32xf32>
    tpu.vector_store %arg7[%c1_108, %c3_109, %c0_110, %c0_111], %132 {strides = array<i32>} : memref<2x8x16x32xf32, #tpu.memory_space<vmem>>, vector<1x1x16x32xf32>,
    %c0_112 = arith.constant 0 : index
    %c4 = arith.constant 4 : index
    %c0_113 = arith.constant 0 : index
    %c0_114 = arith.constant 0 : index
    %133 = vector.load %arg3[%c0_112, %c4, %c0_113, %c0_114] : memref<2x8x16x32xf32, #tpu.memory_space<vmem>>, vector<1x1x16x32xf32>
    %134 = vector.shape_cast %133 : vector<1x1x16x32xf32> to vector<16x32xf32>
    %c1_115 = arith.constant 1 : index
    %c4_116 = arith.constant 4 : index
    %c0_117 = arith.constant 0 : index
    %c0_118 = arith.constant 0 : index
    %135 = vector.load %arg3[%c1_115, %c4_116, %c0_117, %c0_118] : memref<2x8x16x32xf32, #tpu.memory_space<vmem>>, vector<1x1x16x32xf32>
    %136 = vector.shape_cast %135 : vector<1x1x16x32xf32> to vector<16x32xf32>
    %137 = tpu.concatenate %134, %136 in 0 : vector<16x32xf32>, vector<16x32xf32> -> vector<32x32xf32>
    %cst_119 = arith.constant dense<0.000000e+00> : vector<32x32xf32>
    %138 = tpu.matmul %116, %3, %cst_119 {dimension_numbers = #tpu.dot_dimension_numbers<[1], [0], [0], [1], [0, 0, 1, 1], [], []>} : vector<32x32xf32>, vector<32x32xf32>, vector<32x32xf32> -> vector<32x32xf32>
    %cst_120 = arith.constant 0.899999976 : f32
    %139 = vector.broadcast %cst_120 : f32 to vector<32x32xf32>
    %140 = arith.mulf %139, %112 : vector<32x32xf32>
    %141 = arith.addf %140, %137 : vector<32x32xf32>
    %142 = arith.addf %141, %138 : vector<32x32xf32>
    %143 = arith.addf %142, %6 : vector<32x32xf32>
    %cst_121 = arith.constant 1.000000e+00 : f32
    %144 = vector.broadcast %cst_121 : f32 to vector<32x32xf32>
    %145 = arith.cmpf ogt, %143, %144 : vector<32x32xf32>
    %146 = arith.extui %145 : vector<32x32xi1> to vector<32x32xi32>
    %147 = arith.sitofp %146 : vector<32x32xi32> to vector<32x32xf32>
    %148 = vector.extract_strided_slice %147 {offsets = [0, 0], sizes = [16, 32], strides = [1, 1]} : vector<32x32xf32> to vector<16x32xf32>
    %c0_122 = arith.constant 0 : index
    %c4_123 = arith.constant 4 : index
    %c0_124 = arith.constant 0 : index
    %c0_125 = arith.constant 0 : index
    %149 = vector.load %arg6[%c0_122, %c4_123, %c0_124, %c0_125] : memref<2x8x16x32xf32, #tpu.memory_space<vmem>>, vector<1x1x16x32xf32>
    %150 = vector.shape_cast %149 : vector<1x1x16x32xf32> to vector<16x32xf32>
    %151 = vector.shape_cast %148 : vector<16x32xf32> to vector<1x1x16x32xf32>
    tpu.vector_store %arg6[%c0_122, %c4_123, %c0_124, %c0_125], %151 {strides = array<i32>} : memref<2x8x16x32xf32, #tpu.memory_space<vmem>>, vector<1x1x16x32xf32>,
    %152 = vector.extract_strided_slice %143 {offsets = [0, 0], sizes = [16, 32], strides = [1, 1]} : vector<32x32xf32> to vector<16x32xf32>
    %c0_126 = arith.constant 0 : index
    %c4_127 = arith.constant 4 : index
    %c0_128 = arith.constant 0 : index
    %c0_129 = arith.constant 0 : index
    %153 = vector.load %arg7[%c0_126, %c4_127, %c0_128, %c0_129] : memref<2x8x16x32xf32, #tpu.memory_space<vmem>>, vector<1x1x16x32xf32>
    %154 = vector.shape_cast %153 : vector<1x1x16x32xf32> to vector<16x32xf32>
    %155 = vector.shape_cast %152 : vector<16x32xf32> to vector<1x1x16x32xf32>
    tpu.vector_store %arg7[%c0_126, %c4_127, %c0_128, %c0_129], %155 {strides = array<i32>} : memref<2x8x16x32xf32, #tpu.memory_space<vmem>>, vector<1x1x16x32xf32>,
    %156 = vector.extract_strided_slice %147 {offsets = [16, 0], sizes = [16, 32], strides = [1, 1]} : vector<32x32xf32> to vector<16x32xf32>
    %c1_130 = arith.constant 1 : index
    %c4_131 = arith.constant 4 : index
    %c0_132 = arith.constant 0 : index
    %c0_133 = arith.constant 0 : index
    %157 = vector.load %arg6[%c1_130, %c4_131, %c0_132, %c0_133] : memref<2x8x16x32xf32, #tpu.memory_space<vmem>>, vector<1x1x16x32xf32>
    %158 = vector.shape_cast %157 : vector<1x1x16x32xf32> to vector<16x32xf32>
    %159 = vector.shape_cast %156 : vector<16x32xf32> to vector<1x1x16x32xf32>
    tpu.vector_store %arg6[%c1_130, %c4_131, %c0_132, %c0_133], %159 {strides = array<i32>} : memref<2x8x16x32xf32, #tpu.memory_space<vmem>>, vector<1x1x16x32xf32>,
    %160 = vector.extract_strided_slice %143 {offsets = [16, 0], sizes = [16, 32], strides = [1, 1]} : vector<32x32xf32> to vector<16x32xf32>
    %c1_134 = arith.constant 1 : index
    %c4_135 = arith.constant 4 : index
    %c0_136 = arith.constant 0 : index
    %c0_137 = arith.constant 0 : index
    %161 = vector.load %arg7[%c1_134, %c4_135, %c0_136, %c0_137] : memref<2x8x16x32xf32, #tpu.memory_space<vmem>>, vector<1x1x16x32xf32>
    %162 = vector.shape_cast %161 : vector<1x1x16x32xf32> to vector<16x32xf32>
    %163 = vector.shape_cast %160 : vector<16x32xf32> to vector<1x1x16x32xf32>
    tpu.vector_store %arg7[%c1_134, %c4_135, %c0_136, %c0_137], %163 {strides = array<i32>} : memref<2x8x16x32xf32, #tpu.memory_space<vmem>>, vector<1x1x16x32xf32>,
    %c0_138 = arith.constant 0 : index
    %c5 = arith.constant 5 : index
    %c0_139 = arith.constant 0 : index
    %c0_140 = arith.constant 0 : index
    %164 = vector.load %arg3[%c0_138, %c5, %c0_139, %c0_140] : memref<2x8x16x32xf32, #tpu.memory_space<vmem>>, vector<1x1x16x32xf32>
    %165 = vector.shape_cast %164 : vector<1x1x16x32xf32> to vector<16x32xf32>
    %c1_141 = arith.constant 1 : index
    %c5_142 = arith.constant 5 : index
    %c0_143 = arith.constant 0 : index
    %c0_144 = arith.constant 0 : index
    %166 = vector.load %arg3[%c1_141, %c5_142, %c0_143, %c0_144] : memref<2x8x16x32xf32, #tpu.memory_space<vmem>>, vector<1x1x16x32xf32>
    %167 = vector.shape_cast %166 : vector<1x1x16x32xf32> to vector<16x32xf32>
    %168 = tpu.concatenate %165, %167 in 0 : vector<16x32xf32>, vector<16x32xf32> -> vector<32x32xf32>
    %cst_145 = arith.constant dense<0.000000e+00> : vector<32x32xf32>
    %169 = tpu.matmul %147, %3, %cst_145 {dimension_numbers = #tpu.dot_dimension_numbers<[1], [0], [0], [1], [0, 0, 1, 1], [], []>} : vector<32x32xf32>, vector<32x32xf32>, vector<32x32xf32> -> vector<32x32xf32>
    %cst_146 = arith.constant 0.899999976 : f32
    %170 = vector.broadcast %cst_146 : f32 to vector<32x32xf32>
    %171 = arith.mulf %170, %143 : vector<32x32xf32>
    %172 = arith.addf %171, %168 : vector<32x32xf32>
    %173 = arith.addf %172, %169 : vector<32x32xf32>
    %174 = arith.addf %173, %6 : vector<32x32xf32>
    %cst_147 = arith.constant 1.000000e+00 : f32
    %175 = vector.broadcast %cst_147 : f32 to vector<32x32xf32>
    %176 = arith.cmpf ogt, %174, %175 : vector<32x32xf32>
    %177 = arith.extui %176 : vector<32x32xi1> to vector<32x32xi32>
    %178 = arith.sitofp %177 : vector<32x32xi32> to vector<32x32xf32>
    %179 = vector.extract_strided_slice %178 {offsets = [0, 0], sizes = [16, 32], strides = [1, 1]} : vector<32x32xf32> to vector<16x32xf32>
    %c0_148 = arith.constant 0 : index
    %c5_149 = arith.constant 5 : index
    %c0_150 = arith.constant 0 : index
    %c0_151 = arith.constant 0 : index
    %180 = vector.load %arg6[%c0_148, %c5_149, %c0_150, %c0_151] : memref<2x8x16x32xf32, #tpu.memory_space<vmem>>, vector<1x1x16x32xf32>
    %181 = vector.shape_cast %180 : vector<1x1x16x32xf32> to vector<16x32xf32>
    %182 = vector.shape_cast %179 : vector<16x32xf32> to vector<1x1x16x32xf32>
    tpu.vector_store %arg6[%c0_148, %c5_149, %c0_150, %c0_151], %182 {strides = array<i32>} : memref<2x8x16x32xf32, #tpu.memory_space<vmem>>, vector<1x1x16x32xf32>,
    %183 = vector.extract_strided_slice %174 {offsets = [0, 0], sizes = [16, 32], strides = [1, 1]} : vector<32x32xf32> to vector<16x32xf32>
    %c0_152 = arith.constant 0 : index
    %c5_153 = arith.constant 5 : index
    %c0_154 = arith.constant 0 : index
    %c0_155 = arith.constant 0 : index
    %184 = vector.load %arg7[%c0_152, %c5_153, %c0_154, %c0_155] : memref<2x8x16x32xf32, #tpu.memory_space<vmem>>, vector<1x1x16x32xf32>
    %185 = vector.shape_cast %184 : vector<1x1x16x32xf32> to vector<16x32xf32>
    %186 = vector.shape_cast %183 : vector<16x32xf32> to vector<1x1x16x32xf32>
    tpu.vector_store %arg7[%c0_152, %c5_153, %c0_154, %c0_155], %186 {strides = array<i32>} : memref<2x8x16x32xf32, #tpu.memory_space<vmem>>, vector<1x1x16x32xf32>,
    %187 = vector.extract_strided_slice %178 {offsets = [16, 0], sizes = [16, 32], strides = [1, 1]} : vector<32x32xf32> to vector<16x32xf32>
    %c1_156 = arith.constant 1 : index
    %c5_157 = arith.constant 5 : index
    %c0_158 = arith.constant 0 : index
    %c0_159 = arith.constant 0 : index
    %188 = vector.load %arg6[%c1_156, %c5_157, %c0_158, %c0_159] : memref<2x8x16x32xf32, #tpu.memory_space<vmem>>, vector<1x1x16x32xf32>
    %189 = vector.shape_cast %188 : vector<1x1x16x32xf32> to vector<16x32xf32>
    %190 = vector.shape_cast %187 : vector<16x32xf32> to vector<1x1x16x32xf32>
    tpu.vector_store %arg6[%c1_156, %c5_157, %c0_158, %c0_159], %190 {strides = array<i32>} : memref<2x8x16x32xf32, #tpu.memory_space<vmem>>, vector<1x1x16x32xf32>,
    %191 = vector.extract_strided_slice %174 {offsets = [16, 0], sizes = [16, 32], strides = [1, 1]} : vector<32x32xf32> to vector<16x32xf32>
    %c1_160 = arith.constant 1 : index
    %c5_161 = arith.constant 5 : index
    %c0_162 = arith.constant 0 : index
    %c0_163 = arith.constant 0 : index
    %192 = vector.load %arg7[%c1_160, %c5_161, %c0_162, %c0_163] : memref<2x8x16x32xf32, #tpu.memory_space<vmem>>, vector<1x1x16x32xf32>
    %193 = vector.shape_cast %192 : vector<1x1x16x32xf32> to vector<16x32xf32>
    %194 = vector.shape_cast %191 : vector<16x32xf32> to vector<1x1x16x32xf32>
    tpu.vector_store %arg7[%c1_160, %c5_161, %c0_162, %c0_163], %194 {strides = array<i32>} : memref<2x8x16x32xf32, #tpu.memory_space<vmem>>, vector<1x1x16x32xf32>,
    %c0_164 = arith.constant 0 : index
    %c6 = arith.constant 6 : index
    %c0_165 = arith.constant 0 : index
    %c0_166 = arith.constant 0 : index
    %195 = vector.load %arg3[%c0_164, %c6, %c0_165, %c0_166] : memref<2x8x16x32xf32, #tpu.memory_space<vmem>>, vector<1x1x16x32xf32>
    %196 = vector.shape_cast %195 : vector<1x1x16x32xf32> to vector<16x32xf32>
    %c1_167 = arith.constant 1 : index
    %c6_168 = arith.constant 6 : index
    %c0_169 = arith.constant 0 : index
    %c0_170 = arith.constant 0 : index
    %197 = vector.load %arg3[%c1_167, %c6_168, %c0_169, %c0_170] : memref<2x8x16x32xf32, #tpu.memory_space<vmem>>, vector<1x1x16x32xf32>
    %198 = vector.shape_cast %197 : vector<1x1x16x32xf32> to vector<16x32xf32>
    %199 = tpu.concatenate %196, %198 in 0 : vector<16x32xf32>, vector<16x32xf32> -> vector<32x32xf32>
    %cst_171 = arith.constant dense<0.000000e+00> : vector<32x32xf32>
    %200 = tpu.matmul %178, %3, %cst_171 {dimension_numbers = #tpu.dot_dimension_numbers<[1], [0], [0], [1], [0, 0, 1, 1], [], []>} : vector<32x32xf32>, vector<32x32xf32>, vector<32x32xf32> -> vector<32x32xf32>
    %cst_172 = arith.constant 0.899999976 : f32
    %201 = vector.broadcast %cst_172 : f32 to vector<32x32xf32>
    %202 = arith.mulf %201, %174 : vector<32x32xf32>
    %203 = arith.addf %202, %199 : vector<32x32xf32>
    %204 = arith.addf %203, %200 : vector<32x32xf32>
    %205 = arith.addf %204, %6 : vector<32x32xf32>
    %cst_173 = arith.constant 1.000000e+00 : f32
    %206 = vector.broadcast %cst_173 : f32 to vector<32x32xf32>
    %207 = arith.cmpf ogt, %205, %206 : vector<32x32xf32>
    %208 = arith.extui %207 : vector<32x32xi1> to vector<32x32xi32>
    %209 = arith.sitofp %208 : vector<32x32xi32> to vector<32x32xf32>
    %210 = vector.extract_strided_slice %209 {offsets = [0, 0], sizes = [16, 32], strides = [1, 1]} : vector<32x32xf32> to vector<16x32xf32>
    %c0_174 = arith.constant 0 : index
    %c6_175 = arith.constant 6 : index
    %c0_176 = arith.constant 0 : index
    %c0_177 = arith.constant 0 : index
    %211 = vector.load %arg6[%c0_174, %c6_175, %c0_176, %c0_177] : memref<2x8x16x32xf32, #tpu.memory_space<vmem>>, vector<1x1x16x32xf32>
    %212 = vector.shape_cast %211 : vector<1x1x16x32xf32> to vector<16x32xf32>
    %213 = vector.shape_cast %210 : vector<16x32xf32> to vector<1x1x16x32xf32>
    tpu.vector_store %arg6[%c0_174, %c6_175, %c0_176, %c0_177], %213 {strides = array<i32>} : memref<2x8x16x32xf32, #tpu.memory_space<vmem>>, vector<1x1x16x32xf32>,
    %214 = vector.extract_strided_slice %205 {offsets = [0, 0], sizes = [16, 32], strides = [1, 1]} : vector<32x32xf32> to vector<16x32xf32>
    %c0_178 = arith.constant 0 : index
    %c6_179 = arith.constant 6 : index
    %c0_180 = arith.constant 0 : index
    %c0_181 = arith.constant 0 : index
    %215 = vector.load %arg7[%c0_178, %c6_179, %c0_180, %c0_181] : memref<2x8x16x32xf32, #tpu.memory_space<vmem>>, vector<1x1x16x32xf32>
    %216 = vector.shape_cast %215 : vector<1x1x16x32xf32> to vector<16x32xf32>
    %217 = vector.shape_cast %214 : vector<16x32xf32> to vector<1x1x16x32xf32>
    tpu.vector_store %arg7[%c0_178, %c6_179, %c0_180, %c0_181], %217 {strides = array<i32>} : memref<2x8x16x32xf32, #tpu.memory_space<vmem>>, vector<1x1x16x32xf32>,
    %218 = vector.extract_strided_slice %209 {offsets = [16, 0], sizes = [16, 32], strides = [1, 1]} : vector<32x32xf32> to vector<16x32xf32>
    %c1_182 = arith.constant 1 : index
    %c6_183 = arith.constant 6 : index
    %c0_184 = arith.constant 0 : index
    %c0_185 = arith.constant 0 : index
    %219 = vector.load %arg6[%c1_182, %c6_183, %c0_184, %c0_185] : memref<2x8x16x32xf32, #tpu.memory_space<vmem>>, vector<1x1x16x32xf32>
    %220 = vector.shape_cast %219 : vector<1x1x16x32xf32> to vector<16x32xf32>
    %221 = vector.shape_cast %218 : vector<16x32xf32> to vector<1x1x16x32xf32>
    tpu.vector_store %arg6[%c1_182, %c6_183, %c0_184, %c0_185], %221 {strides = array<i32>} : memref<2x8x16x32xf32, #tpu.memory_space<vmem>>, vector<1x1x16x32xf32>,
    %222 = vector.extract_strided_slice %205 {offsets = [16, 0], sizes = [16, 32], strides = [1, 1]} : vector<32x32xf32> to vector<16x32xf32>
    %c1_186 = arith.constant 1 : index
    %c6_187 = arith.constant 6 : index
    %c0_188 = arith.constant 0 : index
    %c0_189 = arith.constant 0 : index
    %223 = vector.load %arg7[%c1_186, %c6_187, %c0_188, %c0_189] : memref<2x8x16x32xf32, #tpu.memory_space<vmem>>, vector<1x1x16x32xf32>
    %224 = vector.shape_cast %223 : vector<1x1x16x32xf32> to vector<16x32xf32>
    %225 = vector.shape_cast %222 : vector<16x32xf32> to vector<1x1x16x32xf32>
    tpu.vector_store %arg7[%c1_186, %c6_187, %c0_188, %c0_189], %225 {strides = array<i32>} : memref<2x8x16x32xf32, #tpu.memory_space<vmem>>, vector<1x1x16x32xf32>,
    %c0_190 = arith.constant 0 : index
    %c7 = arith.constant 7 : index
    %c0_191 = arith.constant 0 : index
    %c0_192 = arith.constant 0 : index
    %226 = vector.load %arg3[%c0_190, %c7, %c0_191, %c0_192] : memref<2x8x16x32xf32, #tpu.memory_space<vmem>>, vector<1x1x16x32xf32>
    %227 = vector.shape_cast %226 : vector<1x1x16x32xf32> to vector<16x32xf32>
    %c1_193 = arith.constant 1 : index
    %c7_194 = arith.constant 7 : index
    %c0_195 = arith.constant 0 : index
    %c0_196 = arith.constant 0 : index
    %228 = vector.load %arg3[%c1_193, %c7_194, %c0_195, %c0_196] : memref<2x8x16x32xf32, #tpu.memory_space<vmem>>, vector<1x1x16x32xf32>
    %229 = vector.shape_cast %228 : vector<1x1x16x32xf32> to vector<16x32xf32>
    %230 = tpu.concatenate %227, %229 in 0 : vector<16x32xf32>, vector<16x32xf32> -> vector<32x32xf32>
    %cst_197 = arith.constant dense<0.000000e+00> : vector<32x32xf32>
    %231 = tpu.matmul %209, %3, %cst_197 {dimension_numbers = #tpu.dot_dimension_numbers<[1], [0], [0], [1], [0, 0, 1, 1], [], []>} : vector<32x32xf32>, vector<32x32xf32>, vector<32x32xf32> -> vector<32x32xf32>
    %cst_198 = arith.constant 0.899999976 : f32
    %232 = vector.broadcast %cst_198 : f32 to vector<32x32xf32>
    %233 = arith.mulf %232, %205 : vector<32x32xf32>
    %234 = arith.addf %233, %230 : vector<32x32xf32>
    %235 = arith.addf %234, %231 : vector<32x32xf32>
    %236 = arith.addf %235, %6 : vector<32x32xf32>
    %cst_199 = arith.constant 1.000000e+00 : f32
    %237 = vector.broadcast %cst_199 : f32 to vector<32x32xf32>
    %238 = arith.cmpf ogt, %236, %237 : vector<32x32xf32>
    %239 = arith.extui %238 : vector<32x32xi1> to vector<32x32xi32>
    %240 = arith.sitofp %239 : vector<32x32xi32> to vector<32x32xf32>
    %241 = vector.extract_strided_slice %240 {offsets = [0, 0], sizes = [16, 32], strides = [1, 1]} : vector<32x32xf32> to vector<16x32xf32>
    %c0_200 = arith.constant 0 : index
    %c7_201 = arith.constant 7 : index
    %c0_202 = arith.constant 0 : index
    %c0_203 = arith.constant 0 : index
    %242 = vector.load %arg6[%c0_200, %c7_201, %c0_202, %c0_203] : memref<2x8x16x32xf32, #tpu.memory_space<vmem>>, vector<1x1x16x32xf32>
    %243 = vector.shape_cast %242 : vector<1x1x16x32xf32> to vector<16x32xf32>
    %244 = vector.shape_cast %241 : vector<16x32xf32> to vector<1x1x16x32xf32>
    tpu.vector_store %arg6[%c0_200, %c7_201, %c0_202, %c0_203], %244 {strides = array<i32>} : memref<2x8x16x32xf32, #tpu.memory_space<vmem>>, vector<1x1x16x32xf32>,
    %245 = vector.extract_strided_slice %236 {offsets = [0, 0], sizes = [16, 32], strides = [1, 1]} : vector<32x32xf32> to vector<16x32xf32>
    %c0_204 = arith.constant 0 : index
    %c7_205 = arith.constant 7 : index
    %c0_206 = arith.constant 0 : index
    %c0_207 = arith.constant 0 : index
    %246 = vector.load %arg7[%c0_204, %c7_205, %c0_206, %c0_207] : memref<2x8x16x32xf32, #tpu.memory_space<vmem>>, vector<1x1x16x32xf32>
    %247 = vector.shape_cast %246 : vector<1x1x16x32xf32> to vector<16x32xf32>
    %248 = vector.shape_cast %245 : vector<16x32xf32> to vector<1x1x16x32xf32>
    tpu.vector_store %arg7[%c0_204, %c7_205, %c0_206, %c0_207], %248 {strides = array<i32>} : memref<2x8x16x32xf32, #tpu.memory_space<vmem>>, vector<1x1x16x32xf32>,
    %249 = vector.extract_strided_slice %240 {offsets = [16, 0], sizes = [16, 32], strides = [1, 1]} : vector<32x32xf32> to vector<16x32xf32>
    %c1_208 = arith.constant 1 : index
    %c7_209 = arith.constant 7 : index
    %c0_210 = arith.constant 0 : index
    %c0_211 = arith.constant 0 : index
    %250 = vector.load %arg6[%c1_208, %c7_209, %c0_210, %c0_211] : memref<2x8x16x32xf32, #tpu.memory_space<vmem>>, vector<1x1x16x32xf32>
    %251 = vector.shape_cast %250 : vector<1x1x16x32xf32> to vector<16x32xf32>
    %252 = vector.shape_cast %249 : vector<16x32xf32> to vector<1x1x16x32xf32>
    tpu.vector_store %arg6[%c1_208, %c7_209, %c0_210, %c0_211], %252 {strides = array<i32>} : memref<2x8x16x32xf32, #tpu.memory_space<vmem>>, vector<1x1x16x32xf32>,
    %253 = vector.extract_strided_slice %236 {offsets = [16, 0], sizes = [16, 32], strides = [1, 1]} : vector<32x32xf32> to vector<16x32xf32>
    %c1_212 = arith.constant 1 : index
    %c7_213 = arith.constant 7 : index
    %c0_214 = arith.constant 0 : index
    %c0_215 = arith.constant 0 : index
    %254 = vector.load %arg7[%c1_212, %c7_213, %c0_214, %c0_215] : memref<2x8x16x32xf32, #tpu.memory_space<vmem>>, vector<1x1x16x32xf32>
    %255 = vector.shape_cast %254 : vector<1x1x16x32xf32> to vector<16x32xf32>
    %256 = vector.shape_cast %253 : vector<16x32xf32> to vector<1x1x16x32xf32>
    tpu.vector_store %arg7[%c1_212, %c7_213, %c0_214, %c0_215], %256 {strides = array<i32>} : memref<2x8x16x32xf32, #tpu.memory_space<vmem>>, vector<1x1x16x32xf32>,
    %c0_216 = arith.constant 0 : index
    %c0_217 = arith.constant 0 : index
    %257 = vector.load %arg8[%c0_216, %c0_217] : memref<32x32xf32, #tpu.memory_space<vmem>>, vector<32x32xf32>
    tpu.vector_store %arg8[%c0_216, %c0_217], %240 {strides = array<i32>} : memref<32x32xf32, #tpu.memory_space<vmem>>, vector<32x32xf32>,
    %c0_218 = arith.constant 0 : index
    %c0_219 = arith.constant 0 : index
    %258 = vector.load %arg9[%c0_218, %c0_219] : memref<32x32xf32, #tpu.memory_space<vmem>>, vector<32x32xf32>
    tpu.vector_store %arg9[%c0_218, %c0_219], %236 {strides = array<i32>} : memref<32x32xf32, #tpu.memory_space<vmem>>, vector<32x32xf32>,
    return
  }
  func.func @transform_0(%arg0: i32, %arg1: i32, %arg2: i32) -> (i32, i32, i32, i32) {
    %c0_i32 = arith.constant 0 : i32
    %c0_i32_0 = arith.constant 0 : i32
    return %arg0, %arg2, %arg1, %c0_i32 : i32, i32, i32, i32
  }
  func.func @transform_1(%arg0: i32, %arg1: i32, %arg2: i32) -> (i32, i32) {
    %c0_i32 = arith.constant 0 : i32
    %c0_i32_0 = arith.constant 0 : i32
    %c0_i32_1 = arith.constant 0 : i32
    return %c0_i32, %c0_i32_0 : i32, i32
  }
  func.func @transform_2(%arg0: i32, %arg1: i32, %arg2: i32) -> (i32, i32) {
    %c0_i32 = arith.constant 0 : i32
    %c0_i32_0 = arith.constant 0 : i32
    %c0_i32_1 = arith.constant 0 : i32
    return %c0_i32, %c0_i32_0 : i32, i32
  }
  func.func @transform_3(%arg0: i32, %arg1: i32, %arg2: i32) -> (i32, i32, i32, i32) {
    %c0_i32 = arith.constant 0 : i32
    %c0_i32_0 = arith.constant 0 : i32
    return %arg0, %arg2, %arg1, %c0_i32 : i32, i32, i32, i32
  }
  func.func @transform_4(%arg0: i32, %arg1: i32, %arg2: i32) -> (i32, i32, i32, i32) {
    %c0_i32 = arith.constant 0 : i32
    %c0_i32_0 = arith.constant 0 : i32
    return %arg0, %arg2, %arg1, %c0_i32 : i32, i32, i32, i32
  }
}

</mosaic_0001>

<bundles_post_ra>
// kernel: tpu_custom_call.1
= control target key start
LH: loop header
LB: loop body
LE: loop exit
PB: predicated region body
PF: predicated region fallthrough
CT: control target
= control target key end

     0   :  { %10 = vsyncpa [#allocation5], 0  ;;  %s1915_s0 = inlined_call_operand.hbm [shape: f32[2,8,16,32], index: 0, kind: input, shape index: {}]   ;;  %s1916_s1 = inlined_call_operand.hbm [shape: f32[32,32], index: 1, kind: input, shape index: {}]   ;;  %s1917_s2 = inlined_call_operand.vmem [shape: f32[1,32], index: 2, kind: input, shape index: {}]   ;;  %s1918_s3 = inlined_call_operand.hbm [shape: f32[2,8,16,32], index: 3, kind: output, shape index: {0}]   ;;  %s1919_s4 = inlined_call_operand.hbm [shape: f32[2,8,16,32], index: 4, kind: output, shape index: {1}]  }
   0x1   :  { %11 = vsyncpa [#allocation8], 0 }
   0x2   :  { %12 = vsyncpa [#allocation6], 0 }
   0x3   :  { %13 = vsyncpa [#allocation11], 0  ;;  %s1598_s15 = smov [#allocation4]  }
   0x4   :  { %s19_s16 = sshll.u32 %s1598_s15, 4  ;;  %s20_s16 = int_to_ptr.vmem [resolvable:$true] %s19_s16 }
   0x5   :  { %s1518_s17 = scalar_lea.vmem %s20_s16, 4096  ;;  %p1523_p1 = scmp.lt.s32.totalorder %s20_s16, %s20_s16 }
   0x6   :  { %p1519_p0 = scmp.ne.s32.totalorder %s20_s16, %s1518_s17  ;;  %p1524_p2 = scmp.lt.s32.totalorder %s1518_s17, %s1518_s17 }
   0x8   :  { %p1525_p3 = por %p1524_p2, %p1523_p1 }
   0xa   :  { %p1526_p4 = pnand %p1525_p3, %p1519_p0 }
   0xc   :  { %1529 = shalt.err (!%p1526_p4)
}
   0xd   :  { %s1599_s18 = smov 128   ;;  %s1600_s19 = smov 8  }
   0xe   :  { %25 = dma.hbm_to_vmem [thread:$0]  %s1915_s0, 4096, %s20_s16, [#allocation5], %s1599_s18, %s1599_s18, %s1600_s19  }
   0xf   :  { %s1601_s22 = smov [#allocation7]  }
  0x10   :  { %s31_s23 = sshll.u32 %s1601_s22, 4  ;;  %s32_s23 = int_to_ptr.vmem [resolvable:$true] %s31_s23 }
  0x11   :  { %s1538_s24 = scalar_lea.vmem %s32_s23, 512  ;;  %p1543_p6 = scmp.lt.s32.totalorder %s32_s23, %s32_s23 }
  0x12   :  { %p1539_p5 = scmp.ne.s32.totalorder %s32_s23, %s1538_s24  ;;  %p1544_p7 = scmp.lt.s32.totalorder %s1538_s24, %s1538_s24 }
  0x14   :  { %p1545_p8 = por %p1544_p7, %p1543_p6 }
  0x16   :  { %p1546_p9 = pnand %p1545_p8, %p1539_p5 }
  0x18   :  { %1549 = shalt.err (!%p1546_p9)
}
  0x19   :  { %37 = dma.hbm_to_vmem [thread:$0]  %s1916_s1, 512, %s32_s23, [#allocation8], %s1599_s18, %s1599_s18, %s1600_s19  }
  0x1a   :  { %1590 = dma.done.wait [#allocation5], 4096  }
  0x1b   :  { %1591 = vsyncadd [#allocation5], 4294963200 }
  0x1c   :  { %1592 = dma.done.wait [#allocation8], 512  }
  0x1d   :  { %1593 = vsyncadd [#allocation8], 4294966784  ;;  %vm50_vm0 = vcmask 261120   ;;  %v1602_v0 = vmov 0.0   ;;  %v1658_v1 = vld [vmem:[#allocation7 + $0x18] sm:$0xff]  ;;  %v1660_v2 = vld [vmem:[#allocation7 + $0x10] sm:$0xff] }
  0x1e   :  { %51 = vst.msk [vmem:[#allocation2] sm:$0xff] %vm50_vm0, %v1602_v0  ;;  %52 = vst.msk [vmem:[#allocation2 + $0x8] sm:$0xff] %vm50_vm0, %v1602_v0  ;;  %1391 = vmatprep.subr.mxu0 %v1658_v1  ;;  %1405 = vmatprep.subr.mxu1 %v1658_v1  ;;  %v1665_v4 = vld [vmem:[#allocation7 + $0x8] sm:$0xff]  ;;  %v1671_v5 = vld [vmem:[#allocation7] sm:$0xff]  ;;  %s1604_s28 = smov [#allocation9]  }
  0x1f   :  { %53 = vst.msk [vmem:[#allocation2 + $0x10] sm:$0xff] %vm50_vm0, %v1602_v0  ;;  %54 = vst.msk [vmem:[#allocation2 + $0x18] sm:$0xff] %vm50_vm0, %v1602_v0  ;;  %1392 = vmatpush3.msra.mxu0 %v1658_v1  ;;  %1406 = vmatpush3.msra.mxu1 %v1658_v1  ;;  %v79_v12 = vld [vmem:[#allocation4 + $0x8] sm:$0xff]  ;;  %v78_v15 = vld [vmem:[#allocation4] sm:$0xff]  ;;  %s1233_s29 = sshll.u32 %s1604_s28, 4  ;;  %s1234_s29 = int_to_ptr.vmem [resolvable:$true] %s1233_s29 }
  0x20   :  { %55 = vst.msk [vmem:[#allocation3] sm:$0xff] %vm50_vm0, %v1602_v0  ;;  %56 = vst.msk [vmem:[#allocation3 + $0x8] sm:$0xff] %vm50_vm0, %v1602_v0  ;;  %1393 = vmatprep.subr.mxu0 %v1660_v2  ;;  %1407 = vmatprep.subr.mxu1 %v1660_v2  ;;  %v82_v19 = vld [vmem:[#allocation4 + $0x88] sm:$0xff]  ;;  %v1699_v22 = vld [vmem:[%s1917_s2] ss:$0 sm:$0xff]  ;;  %s1603_s2 = smov [#allocation10]  }
  0x21   :  { %57 = vst.msk [vmem:[#allocation3 + $0x10] sm:$0xff] %vm50_vm0, %v1602_v0  ;;  %58 = vst.msk [vmem:[#allocation3 + $0x18] sm:$0xff] %vm50_vm0, %v1602_v0  ;;  %1394 = vmatpush3.msra.mxu0 %v1660_v2  ;;  %1408 = vmatpush3.msra.mxu1 %v1660_v2  ;;  %v81_v24 = vld [vmem:[#allocation4 + $0x80] sm:$0xff]  ;;  %v221_v43 = vld [vmem:[#allocation4 + $0x18] sm:$0xff]  ;;  %s1245_s27 = sshll.u32 %s1603_s2, 4  ;;  %s1246_s27 = int_to_ptr.vmem [resolvable:$true] %s1245_s27 }
  0x22   :  { %1395 = vmatprep.subr.mxu0 %v1665_v4  ;;  %1409 = vmatprep.subr.mxu1 %v1665_v4  ;;  %v220_v45 = vld [vmem:[#allocation4 + $0x10] sm:$0xff]  ;;  %v224_v49 = vld [vmem:[#allocation4 + $0x98] sm:$0xff]  ;;  %s1550_s30 = scalar_lea.vmem %s1246_s27, 4096  ;;  %p1555_p11 = scmp.lt.s32.totalorder %s1246_s27, %s1246_s27 }
  0x23   :  { %1396 = vmatpush3.msra.mxu0 %v1665_v4  ;;  %1410 = vmatpush3.msra.mxu1 %v1665_v4  ;;  %v223_v54 = vld [vmem:[#allocation4 + $0x90] sm:$0xff]  ;;  %p1551_p10 = scmp.ne.s32.totalorder %s1246_s27, %s1550_s30  ;;  %p1556_p12 = scmp.lt.s32.totalorder %s1550_s30, %s1550_s30 }
  0x24   :  { %1397 = vmatprep.subr.mxu0 %v1671_v5  ;;  %1411 = vmatprep.subr.mxu1 %v1671_v5 }
  0x25   :  { %v70_v3 = vld [vmem:[#allocation2] sm:$0xff]  ;;  %v71_v6 = vld [vmem:[#allocation2 + $0x8] sm:$0xff]  ;;  %1398 = vmatpush3.msra.mxu0 %v1671_v5  ;;  %1412 = vmatpush3.msra.mxu1 %v1671_v5  ;;  %p1557_p13 = por %p1556_p12, %p1555_p11 }
  0x26   :  { %1399 = vmatprep.mubr.msk.f32.mxu0 %vm50_vm0, %v70_v3  ;;  %v72_v7 = vld [vmem:[#allocation2 + $0x10] sm:$0xff]  ;;  %v73_v8 = vld [vmem:[#allocation2 + $0x18] sm:$0xff]  ;;  %1419 = vmatprep.subr.mxu0 %v1658_v1 }
  0x27   :  { %1400 = vmatmul.mubr.msk.f32.vlgmr.msra.gmra.mxu0 %vm50_vm0, %v71_v6  ;;  %1433 = vmatprep.subr.mxu1 %v1658_v1  ;;  %v75_v9 = vld [vmem:[#allocation3 + $0x8] sm:$0xff]  ;;  %v74_v10 = vld [vmem:[#allocation3] sm:$0xff]  ;;  %p1558_p0 = pnand %p1557_p13, %p1551_p10 }
  0x28   :  { %1402 = vmatprep.mubr.msk.f32.mxu0 %vm50_vm0, %v72_v7  ;;  %1420 = vmatpush3.msra.mxu0 %v1658_v1  ;;  %v182_v11 = vmul.f32 0.9, %v75_v9  ;;  %v77_v13 = vld [vmem:[#allocation3 + $0x18] sm:$0xff]  ;;  %v181_v14 = vmul.f32 0.9, %v74_v10  ;;  %v76_v16 = vld [vmem:[#allocation3 + $0x10] sm:$0xff] }
  0x29   :  { %1421 = vmatprep.subr.mxu0 %v1660_v2  ;;  %v184_v18 = vmul.f32 0.9, %v77_v13  ;;  %v183_v21 = vmul.f32 0.9, %v76_v16 }
  0x2a   :  { %1422 = vmatpush3.msra.mxu0 %v1660_v2  ;;  %v186_v17 = vadd.f32 %v182_v11, %v79_v12  ;;  %v185_v20 = vadd.f32 %v181_v14, %v78_v15  ;;  %v364_v12 = vld [vmem:[#allocation4 + $0x28] sm:$0xff]  ;;  %v363_v14 = vld [vmem:[#allocation4 + $0x20] sm:$0xff] }
  0x2b   :  { %1403 = vmatmul.mubr.msk.f32.gmra.mxu0 %vm50_vm0, %v73_v8  ;;  %1423 = vmatprep.subr.mxu0 %v1665_v4  ;;  %v188_v26 = vadd.f32 %v184_v18, %v82_v19  ;;  %v187_v30 = vadd.f32 %v183_v21, %v81_v24  ;;  %v367_v18 = vld [vmem:[#allocation4 + $0xa8] sm:$0xff]  ;;  %v366_v24 = vld [vmem:[#allocation4 + $0xa0] sm:$0xff] }
  0x2c   :  { %1424 = vmatpush3.msra.mxu0 %v1665_v4 }
  0x2d   :  { %1425 = vmatprep.subr.mxu0 %v1671_v5 }
  0x2e   :  { %1426 = vmatpush3.msra.mxu0 %v1671_v5 }
  0x2f   :  { %1447 = vmatprep.subr.mxu0 %v1658_v1 }
  0xe7   :  { %v1401_v23 = vpop.f32.mrf.mxu0 }
  0xe8   :  { %v190_v25 = vadd.f32 %v1401_v23, %v186_v17 }
  0xe9   :  { %v162_v27 = vpop.f32.mrf.mxu0 }
  0xea   :  { %v194_v28 = vadd.f32 %v1699_v22, %v190_v25  ;;  %v189_v29 = vadd.f32 %v185_v20, %v162_v27 }
  0xeb   :  { %v1404_v31 = vpop.f32.mrf.mxu0 }
  0xec   :  { %212 = vst.msk [vmem:[#allocation10 + $0x8] sm:$0xff] %vm50_vm0, %v194_v28  ;;  %v193_v32 = vadd.f32 %v1699_v22, %v189_v29  ;;  %v192_v33 = vadd.f32 %v1404_v31, %v188_v26  ;;  %vm198_vm1 = vcmp.gt.f32.partialorder %v194_v28, 1.0  ;;  %v323_v42 = vmul.f32 0.9, %v194_v28 }
  0xed   :  { %v172_v34 = vpop.f32.mrf.mxu0  ;;  %v1268_v35 = vsel %vm198_vm1, 1.0, %v1602_v0 }
  0xee   :  { %211 = vst.msk [vmem:[#allocation10] sm:$0xff] %vm50_vm0, %v193_v32  ;;  %v196_v36 = vadd.f32 %v1699_v22, %v192_v33  ;;  %v191_v37 = vadd.f32 %v187_v30, %v172_v34  ;;  %vm197_vm2 = vcmp.gt.f32.partialorder %v193_v32, 1.0  ;;  %210 = vst.msk [vmem:[#allocation9 + $0x8] sm:$0xff] %vm50_vm0, %v1268_v35  ;;  %v322_v44 = vmul.f32 0.9, %v193_v32 }
  0xef   :  { %v1267_v38 = vsel %vm197_vm2, 1.0, %v1602_v0  ;;  %v327_v46 = vadd.f32 %v323_v42, %v221_v43  ;;  %v506_v43 = vld [vmem:[#allocation4 + $0x30] sm:$0xff] }
  0xf0   :  { %218 = vst.msk [vmem:[#allocation10 + $0x88] sm:$0xff] %vm50_vm0, %v196_v36  ;;  %v195_v39 = vadd.f32 %v1699_v22, %v191_v37  ;;  %209 = vst.msk [vmem:[#allocation9] sm:$0xff] %vm50_vm0, %v1267_v38  ;;  %1413 = vmatprep.mubr.msk.f32.mxu1 %vm50_vm0, %v1267_v38  ;;  %vm200_vm3 = vcmp.gt.f32.partialorder %v196_v36, 1.0  ;;  %v325_v47 = vmul.f32 0.9, %v196_v36  ;;  %v326_v51 = vadd.f32 %v322_v44, %v220_v45 }
  0xf1   :  { %1414 = vmatmul.mubr.msk.f32.vlgmr.msra.gmra.mxu1 %vm50_vm0, %v1268_v35  ;;  %v1270_v40 = vsel %vm200_vm3, 1.0, %v1602_v0 }
  0xf2   :  { %217 = vst.msk [vmem:[#allocation10 + $0x80] sm:$0xff] %vm50_vm0, %v195_v39  ;;  %vm199_vm4 = vcmp.gt.f32.partialorder %v195_v39, 1.0  ;;  %215 = vst.msk [vmem:[#allocation9 + $0x88] sm:$0xff] %vm50_vm0, %v1270_v40  ;;  %1434 = vmatpush3.msra.mxu1 %v1658_v1  ;;  %v324_v52 = vmul.f32 0.9, %v195_v39  ;;  %v329_v57 = vadd.f32 %v325_v47, %v224_v49  ;;  %v510_v47 = vld [vmem:[#allocation4 + $0xb8] sm:$0xff] }
  0xf3   :  { %v1269_v41 = vsel %vm199_vm4, 1.0, %v1602_v0  ;;  %1435 = vmatprep.subr.mxu1 %v1660_v2 }
  0xf4   :  { %214 = vst.msk [vmem:[#allocation9 + $0x80] sm:$0xff] %vm50_vm0, %v1269_v41  ;;  %1416 = vmatprep.mubr.msk.f32.mxu1 %vm50_vm0, %v1269_v41  ;;  %1436 = vmatpush3.msra.mxu1 %v1660_v2  ;;  %v328_v61 = vadd.f32 %v324_v52, %v223_v54  ;;  %v507_v41 = vld [vmem:[#allocation4 + $0x38] sm:$0xff]  ;;  %v509_v52 = vld [vmem:[#allocation4 + $0xb0] sm:$0xff] }
  0xf5   :  { %1417 = vmatmul.mubr.msk.f32.gmra.mxu1 %vm50_vm0, %v1270_v40  ;;  %1437 = vmatprep.subr.mxu1 %v1665_v4 }
  0xf6   :  { %1438 = vmatpush3.msra.mxu1 %v1665_v4 }
  0xf7   :  { %1439 = vmatprep.subr.mxu1 %v1671_v5 }
  0xf8   :  { %1440 = vmatpush3.msra.mxu1 %v1671_v5 }
  0xf9   :  { %1461 = vmatprep.subr.mxu1 %v1658_v1 }
 0x1b1   :  { %v1415_v48 = vpop.f32.mrf.mxu1 }
 0x1b2   :  { %v331_v50 = vadd.f32 %v1415_v48, %v327_v46 }
 0x1b3   :  { %v303_v53 = vpop.f32.mrf.mxu1 }
 0x1b4   :  { %v335_v55 = vadd.f32 %v1699_v22, %v331_v50  ;;  %v330_v56 = vadd.f32 %v326_v51, %v303_v53 }
 0x1b5   :  { %v1418_v58 = vpop.f32.mrf.mxu1 }
 0x1b6   :  { %vm339_vm5 = vcmp.gt.f32.partialorder %v335_v55, 1.0  ;;  %355 = vst.msk [vmem:[#allocation10 + $0x18] sm:$0xff] %vm50_vm0, %v335_v55  ;;  %v334_v59 = vadd.f32 %v1699_v22, %v330_v56  ;;  %v333_v60 = vadd.f32 %v1418_v58, %v329_v57  ;;  %v466_v11 = vmul.f32 0.9, %v335_v55 }
 0x1b7   :  { %v1276_v62 = vsel %vm339_vm5, 1.0, %v1602_v0  ;;  %v313_v63 = vpop.f32.mrf.mxu1 }
 0x1b8   :  { %352 = vst.msk [vmem:[#allocation9 + $0x18] sm:$0xff] %vm50_vm0, %v1276_v62  ;;  %354 = vst.msk [vmem:[#allocation10 + $0x10] sm:$0xff] %vm50_vm0, %v334_v59  ;;  %v337_v3 = vadd.f32 %v1699_v22, %v333_v60  ;;  %v332_v6 = vadd.f32 %v328_v61, %v313_v63  ;;  %vm338_vm6 = vcmp.gt.f32.partialorder %v334_v59, 1.0  ;;  %v465_v13 = vmul.f32 0.9, %v334_v59 }
 0x1b9   :  { %v1275_v7 = vsel %vm338_vm6, 1.0, %v1602_v0  ;;  %v470_v15 = vadd.f32 %v466_v11, %v364_v12  ;;  %v649_v12 = vld [vmem:[#allocation4 + $0x40] sm:$0xff] }
 0x1ba   :  { %361 = vst.msk [vmem:[#allocation10 + $0x98] sm:$0xff] %vm50_vm0, %v337_v3  ;;  %v336_v8 = vadd.f32 %v1699_v22, %v332_v6  ;;  %351 = vst.msk [vmem:[#allocation9 + $0x10] sm:$0xff] %vm50_vm0, %v1275_v7  ;;  %1427 = vmatprep.mubr.msk.f32.mxu0 %vm50_vm0, %v1275_v7  ;;  %vm341_vm7 = vcmp.gt.f32.partialorder %v337_v3, 1.0  ;;  %v468_v16 = vmul.f32 0.9, %v337_v3  ;;  %v469_v20 = vadd.f32 %v465_v13, %v363_v14 }
 0x1bb   :  { %1428 = vmatmul.mubr.msk.f32.vlgmr.msra.gmra.mxu0 %vm50_vm0, %v1276_v62  ;;  %v1278_v9 = vsel %vm341_vm7, 1.0, %v1602_v0 }
 0x1bc   :  { %360 = vst.msk [vmem:[#allocation10 + $0x90] sm:$0xff] %vm50_vm0, %v336_v8  ;;  %vm340_vm8 = vcmp.gt.f32.partialorder %v336_v8, 1.0  ;;  %358 = vst.msk [vmem:[#allocation9 + $0x98] sm:$0xff] %vm50_vm0, %v1278_v9  ;;  %1448 = vmatpush3.msra.mxu0 %v1658_v1  ;;  %v467_v21 = vmul.f32 0.9, %v336_v8  ;;  %v472_v27 = vadd.f32 %v468_v16, %v367_v18  ;;  %v653_v16 = vld [vmem:[#allocation4 + $0xc8] sm:$0xff] }
 0x1bd   :  { %v1277_v10 = vsel %vm340_vm8, 1.0, %v1602_v0  ;;  %1449 = vmatprep.subr.mxu0 %v1660_v2 }
 0x1be   :  { %357 = vst.msk [vmem:[#allocation9 + $0x90] sm:$0xff] %vm50_vm0, %v1277_v10  ;;  %1430 = vmatprep.mubr.msk.f32.mxu0 %vm50_vm0, %v1277_v10  ;;  %1450 = vmatpush3.msra.mxu0 %v1660_v2  ;;  %v471_v31 = vadd.f32 %v467_v21, %v366_v24  ;;  %v650_v10 = vld [vmem:[#allocation4 + $0x48] sm:$0xff]  ;;  %v652_v21 = vld [vmem:[#allocation4 + $0xc0] sm:$0xff] }
 0x1bf   :  { %1431 = vmatmul.mubr.msk.f32.gmra.mxu0 %vm50_vm0, %v1278_v9  ;;  %1451 = vmatprep.subr.mxu0 %v1665_v4 }
 0x1c0   :  { %1452 = vmatpush3.msra.mxu0 %v1665_v4 }
 0x1c1   :  { %1453 = vmatprep.subr.mxu0 %v1671_v5 }
 0x1c2   :  { %1454 = vmatpush3.msra.mxu0 %v1671_v5 }
 0x1c3   :  { %1475 = vmatprep.subr.mxu0 %v1658_v1 }
 0x27b   :  { %v1429_v17 = vpop.f32.mrf.mxu0 }
 0x27c   :  { %v474_v19 = vadd.f32 %v1429_v17, %v470_v15 }
 0x27d   :  { %v446_v23 = vpop.f32.mrf.mxu0 }
 0x27e   :  { %v478_v25 = vadd.f32 %v1699_v22, %v474_v19  ;;  %v473_v26 = vadd.f32 %v469_v20, %v446_v23 }
 0x27f   :  { %v1432_v28 = vpop.f32.mrf.mxu0 }
 0x280   :  { %vm482_vm9 = vcmp.gt.f32.partialorder %v478_v25, 1.0  ;;  %498 = vst.msk [vmem:[#allocation10 + $0x28] sm:$0xff] %vm50_vm0, %v478_v25  ;;  %v477_v29 = vadd.f32 %v1699_v22, %v473_v26  ;;  %v476_v30 = vadd.f32 %v1432_v28, %v472_v27  ;;  %v609_v40 = vmul.f32 0.9, %v478_v25 }
 0x281   :  { %v1284_v32 = vsel %vm482_vm9, 1.0, %v1602_v0  ;;  %v456_v33 = vpop.f32.mrf.mxu0 }
 0x282   :  { %495 = vst.msk [vmem:[#allocation9 + $0x28] sm:$0xff] %vm50_vm0, %v1284_v32  ;;  %497 = vst.msk [vmem:[#allocation10 + $0x20] sm:$0xff] %vm50_vm0, %v477_v29  ;;  %v480_v34 = vadd.f32 %v1699_v22, %v476_v30  ;;  %v475_v35 = vadd.f32 %v471_v31, %v456_v33  ;;  %vm481_vm10 = vcmp.gt.f32.partialorder %v477_v29, 1.0  ;;  %v608_v42 = vmul.f32 0.9, %v477_v29 }
 0x283   :  { %v1283_v36 = vsel %vm481_vm10, 1.0, %v1602_v0  ;;  %v613_v44 = vadd.f32 %v609_v40, %v507_v41  ;;  %v792_v40 = vld [vmem:[#allocation4 + $0x50] sm:$0xff] }
 0x284   :  { %504 = vst.msk [vmem:[#allocation10 + $0xa8] sm:$0xff] %vm50_vm0, %v480_v34  ;;  %v479_v37 = vadd.f32 %v1699_v22, %v475_v35  ;;  %494 = vst.msk [vmem:[#allocation9 + $0x20] sm:$0xff] %vm50_vm0, %v1283_v36  ;;  %1441 = vmatprep.mubr.msk.f32.mxu1 %vm50_vm0, %v1283_v36  ;;  %vm484_vm11 = vcmp.gt.f32.partialorder %v480_v34, 1.0  ;;  %v611_v45 = vmul.f32 0.9, %v480_v34  ;;  %v612_v49 = vadd.f32 %v608_v42, %v506_v43 }
 0x285   :  { %1442 = vmatmul.mubr.msk.f32.vlgmr.msra.gmra.mxu1 %vm50_vm0, %v1284_v32  ;;  %v1286_v38 = vsel %vm484_vm11, 1.0, %v1602_v0 }
 0x286   :  { %503 = vst.msk [vmem:[#allocation10 + $0xa0] sm:$0xff] %vm50_vm0, %v479_v37  ;;  %vm483_vm12 = vcmp.gt.f32.partialorder %v479_v37, 1.0  ;;  %501 = vst.msk [vmem:[#allocation9 + $0xa8] sm:$0xff] %vm50_vm0, %v1286_v38  ;;  %1462 = vmatpush3.msra.mxu1 %v1658_v1  ;;  %v610_v50 = vmul.f32 0.9, %v479_v37  ;;  %v615_v55 = vadd.f32 %v611_v45, %v510_v47 }
 0x287   :  { %v1285_v39 = vsel %vm483_vm12, 1.0, %v1602_v0  ;;  %1463 = vmatprep.subr.mxu1 %v1660_v2 }
 0x288   :  { %500 = vst.msk [vmem:[#allocation9 + $0xa0] sm:$0xff] %vm50_vm0, %v1285_v39  ;;  %1444 = vmatprep.mubr.msk.f32.mxu1 %vm50_vm0, %v1285_v39  ;;  %1464 = vmatpush3.msra.mxu1 %v1660_v2  ;;  %v614_v59 = vadd.f32 %v610_v50, %v509_v52 }
 0x289   :  { %1445 = vmatmul.mubr.msk.f32.gmra.mxu1 %vm50_vm0, %v1286_v38  ;;  %1465 = vmatprep.subr.mxu1 %v1665_v4  ;;  %v793_v38 = vld [vmem:[#allocation4 + $0x58] sm:$0xff] }
 0x28a   :  { %1466 = vmatpush3.msra.mxu1 %v1665_v4 }
 0x28b   :  { %1467 = vmatprep.subr.mxu1 %v1671_v5 }
 0x28c   :  { %1468 = vmatpush3.msra.mxu1 %v1671_v5 }
 0x28d   :  { %1489 = vmatprep.subr.mxu1 %v1658_v1 }
 0x345   :  { %v1443_v46 = vpop.f32.mrf.mxu1 }
 0x346   :  { %v617_v48 = vadd.f32 %v1443_v46, %v613_v44  ;;  %v796_v44 = vld [vmem:[#allocation4 + $0xd8] sm:$0xff] }
 0x347   :  { %v589_v51 = vpop.f32.mrf.mxu1 }
 0x348   :  { %v621_v53 = vadd.f32 %v1699_v22, %v617_v48  ;;  %v616_v54 = vadd.f32 %v612_v49, %v589_v51  ;;  %v795_v48 = vld [vmem:[#allocation4 + $0xd0] sm:$0xff] }
 0x349   :  { %v1446_v56 = vpop.f32.mrf.mxu1 }
 0x34a   :  { %vm625_vm13 = vcmp.gt.f32.partialorder %v621_v53, 1.0  ;;  %641 = vst.msk [vmem:[#allocation10 + $0x38] sm:$0xff] %vm50_vm0, %v621_v53  ;;  %v620_v57 = vadd.f32 %v1699_v22, %v616_v54  ;;  %v619_v58 = vadd.f32 %v1446_v56, %v615_v55  ;;  %v752_v9 = vmul.f32 0.9, %v621_v53 }
 0x34b   :  { %v1292_v60 = vsel %vm625_vm13, 1.0, %v1602_v0  ;;  %v599_v61 = vpop.f32.mrf.mxu1 }
 0x34c   :  { %638 = vst.msk [vmem:[#allocation9 + $0x38] sm:$0xff] %vm50_vm0, %v1292_v60  ;;  %640 = vst.msk [vmem:[#allocation10 + $0x30] sm:$0xff] %vm50_vm0, %v620_v57  ;;  %v623_v62 = vadd.f32 %v1699_v22, %v619_v58  ;;  %v618_v63 = vadd.f32 %v614_v59, %v599_v61  ;;  %vm624_vm14 = vcmp.gt.f32.partialorder %v620_v57, 1.0  ;;  %v751_v11 = vmul.f32 0.9, %v620_v57 }
 0x34d   :  { %v1291_v3 = vsel %vm624_vm14, 1.0, %v1602_v0  ;;  %v756_v13 = vadd.f32 %v752_v9, %v650_v10  ;;  %v939_v10 = vld [vmem:[#allocation4 + $0xe8] sm:$0xff] }
 0x34e   :  { %647 = vst.msk [vmem:[#allocation10 + $0xb8] sm:$0xff] %vm50_vm0, %v623_v62  ;;  %v622_v6 = vadd.f32 %v1699_v22, %v618_v63  ;;  %637 = vst.msk [vmem:[#allocation9 + $0x30] sm:$0xff] %vm50_vm0, %v1291_v3  ;;  %1455 = vmatprep.mubr.msk.f32.mxu0 %vm50_vm0, %v1291_v3  ;;  %vm627_vm15 = vcmp.gt.f32.partialorder %v623_v62, 1.0  ;;  %v754_v14 = vmul.f32 0.9, %v623_v62  ;;  %v755_v18 = vadd.f32 %v751_v11, %v649_v12  ;;  %v936_v63 = vld [vmem:[#allocation4 + $0x68] sm:$0xff] }
 0x34f   :  { %1456 = vmatmul.mubr.msk.f32.vlgmr.msra.gmra.mxu0 %vm50_vm0, %v1292_v60  ;;  %v1294_v7 = vsel %vm627_vm15, 1.0, %v1602_v0 }
 0x350   :  { %646 = vst.msk [vmem:[#allocation10 + $0xb0] sm:$0xff] %vm50_vm0, %v622_v6  ;;  %vm626_vm1 = vcmp.gt.f32.partialorder %v622_v6, 1.0  ;;  %644 = vst.msk [vmem:[#allocation9 + $0xb8] sm:$0xff] %vm50_vm0, %v1294_v7  ;;  %1476 = vmatpush3.msra.mxu0 %v1658_v1  ;;  %v753_v19 = vmul.f32 0.9, %v622_v6  ;;  %v758_v25 = vadd.f32 %v754_v14, %v653_v16  ;;  %v935_v6 = vld [vmem:[#allocation4 + $0x60] sm:$0xff] }
 0x351   :  { %v1293_v8 = vsel %vm626_vm1, 1.0, %v1602_v0  ;;  %1477 = vmatprep.subr.mxu0 %v1660_v2 }
 0x352   :  { %643 = vst.msk [vmem:[#allocation9 + $0xb0] sm:$0xff] %vm50_vm0, %v1293_v8  ;;  %1458 = vmatprep.mubr.msk.f32.mxu0 %vm50_vm0, %v1293_v8  ;;  %1478 = vmatpush3.msra.mxu0 %v1660_v2  ;;  %v757_v29 = vadd.f32 %v753_v19, %v652_v21 }
 0x353   :  { %1459 = vmatmul.mubr.msk.f32.gmra.mxu0 %vm50_vm0, %v1294_v7  ;;  %1479 = vmatprep.subr.mxu0 %v1665_v4 }
 0x354   :  { %1480 = vmatpush3.msra.mxu0 %v1665_v4 }
 0x355   :  { %1481 = vmatprep.subr.mxu0 %v1671_v5 }
 0x356   :  { %1482 = vmatpush3.msra.mxu0 %v1671_v5 }
 0x40f   :  { %v1457_v15 = vpop.f32.mrf.mxu0 }
 0x410   :  { %v760_v17 = vadd.f32 %v1457_v15, %v756_v13  ;;  %v938_v15 = vld [vmem:[#allocation4 + $0xe0] sm:$0xff] }
 0x411   :  { %v732_v20 = vpop.f32.mrf.mxu0 }
 0x412   :  { %v764_v23 = vadd.f32 %v1699_v22, %v760_v17  ;;  %v759_v24 = vadd.f32 %v755_v18, %v732_v20 }
 0x413   :  { %v1460_v26 = vpop.f32.mrf.mxu0 }
 0x414   :  { %vm768_vm2 = vcmp.gt.f32.partialorder %v764_v23, 1.0  ;;  %784 = vst.msk [vmem:[#allocation10 + $0x48] sm:$0xff] %vm50_vm0, %v764_v23  ;;  %v763_v27 = vadd.f32 %v1699_v22, %v759_v24  ;;  %v762_v28 = vadd.f32 %v1460_v26, %v758_v25 }
 0x415   :  { %v1300_v30 = vsel %vm768_vm2, 1.0, %v1602_v0  ;;  %v742_v31 = vpop.f32.mrf.mxu0 }
 0x416   :  { %781 = vst.msk [vmem:[#allocation9 + $0x48] sm:$0xff] %vm50_vm0, %v1300_v30  ;;  %783 = vst.msk [vmem:[#allocation10 + $0x40] sm:$0xff] %vm50_vm0, %v763_v27  ;;  %v766_v32 = vadd.f32 %v1699_v22, %v762_v28  ;;  %v761_v33 = vadd.f32 %v757_v29, %v742_v31  ;;  %vm767_vm3 = vcmp.gt.f32.partialorder %v763_v27, 1.0  ;;  %v894_v39 = vmul.f32 0.9, %v763_v27 }
 0x417   :  { %v1299_v34 = vsel %vm767_vm3, 1.0, %v1602_v0 }
 0x418   :  { %790 = vst.msk [vmem:[#allocation10 + $0xc8] sm:$0xff] %vm50_vm0, %v766_v32  ;;  %v765_v35 = vadd.f32 %v1699_v22, %v761_v33  ;;  %780 = vst.msk [vmem:[#allocation9 + $0x40] sm:$0xff] %vm50_vm0, %v1299_v34  ;;  %1469 = vmatprep.mubr.msk.f32.mxu1 %vm50_vm0, %v1299_v34  ;;  %vm770_vm4 = vcmp.gt.f32.partialorder %v766_v32, 1.0  ;;  %v897_v42 = vmul.f32 0.9, %v766_v32  ;;  %v1079_v33 = vld [vmem:[#allocation4 + $0x78] sm:$0xff] }
 0x419   :  { %1470 = vmatmul.mubr.msk.f32.vlgmr.msra.gmra.mxu1 %vm50_vm0, %v1300_v30  ;;  %v1302_v36 = vsel %vm770_vm4, 1.0, %v1602_v0 }
 0x41a   :  { %789 = vst.msk [vmem:[#allocation10 + $0xc0] sm:$0xff] %vm50_vm0, %v765_v35  ;;  %vm769_vm5 = vcmp.gt.f32.partialorder %v765_v35, 1.0  ;;  %787 = vst.msk [vmem:[#allocation9 + $0xc8] sm:$0xff] %vm50_vm0, %v1302_v36  ;;  %1490 = vmatpush3.msra.mxu1 %v1658_v1  ;;  %v895_v1 = vmul.f32 0.9, %v764_v23  ;;  %v901_v50 = vadd.f32 %v897_v42, %v796_v44 }
 0x41b   :  { %v1301_v37 = vsel %vm769_vm5, 1.0, %v1602_v0  ;;  %1491 = vmatprep.subr.mxu1 %v1660_v2  ;;  %v896_v46 = vmul.f32 0.9, %v765_v35  ;;  %v1078_v35 = vld [vmem:[#allocation4 + $0x70] sm:$0xff] }
 0x41c   :  { %786 = vst.msk [vmem:[#allocation9 + $0xc0] sm:$0xff] %vm50_vm0, %v1301_v37  ;;  %1472 = vmatprep.mubr.msk.f32.mxu1 %vm50_vm0, %v1301_v37  ;;  %1492 = vmatpush3.msra.mxu1 %v1660_v2  ;;  %v899_v41 = vadd.f32 %v895_v1, %v793_v38  ;;  %v898_v2 = vadd.f32 %v894_v39, %v792_v40  ;;  %v1082_v38 = vld [vmem:[#allocation4 + $0xf8] sm:$0xff] }
 0x41d   :  { %1473 = vmatmul.mubr.msk.f32.gmra.mxu1 %vm50_vm0, %v1302_v36  ;;  %1493 = vmatprep.subr.mxu1 %v1665_v4  ;;  %v900_v53 = vadd.f32 %v896_v46, %v795_v48 }
 0x41e   :  { %1494 = vmatpush3.msra.mxu1 %v1665_v4 }
 0x41f   :  { %1495 = vmatprep.subr.mxu1 %v1671_v5 }
 0x420   :  { %1496 = vmatpush3.msra.mxu1 %v1671_v5 }
 0x4d9   :  { %v1471_v43 = vpop.f32.mrf.mxu1 }
 0x4da   :  { %v903_v45 = vadd.f32 %v1471_v43, %v899_v41  ;;  %v1081_v43 = vld [vmem:[#allocation4 + $0xf0] sm:$0xff] }
 0x4db   :  { %v875_v47 = vpop.f32.mrf.mxu1 }
 0x4dc   :  { %v907_v49 = vadd.f32 %v1699_v22, %v903_v45  ;;  %v902_v4 = vadd.f32 %v898_v2, %v875_v47 }
 0x4dd   :  { %v1474_v51 = vpop.f32.mrf.mxu1 }
 0x4de   :  { %vm911_vm6 = vcmp.gt.f32.partialorder %v907_v49, 1.0  ;;  %927 = vst.msk [vmem:[#allocation10 + $0x58] sm:$0xff] %vm50_vm0, %v907_v49  ;;  %v906_v5 = vadd.f32 %v1699_v22, %v902_v4  ;;  %v905_v52 = vadd.f32 %v1474_v51, %v901_v50  ;;  %v1038_v62 = vmul.f32 0.9, %v907_v49 }
 0x4df   :  { %v1308_v54 = vsel %vm911_vm6, 1.0, %v1602_v0  ;;  %v885_v55 = vpop.f32.mrf.mxu1 }
 0x4e0   :  { %924 = vst.msk [vmem:[#allocation9 + $0x58] sm:$0xff] %vm50_vm0, %v1308_v54  ;;  %926 = vst.msk [vmem:[#allocation10 + $0x50] sm:$0xff] %vm50_vm0, %v906_v5  ;;  %v909_v56 = vadd.f32 %v1699_v22, %v905_v52  ;;  %v904_v57 = vadd.f32 %v900_v53, %v885_v55  ;;  %vm910_vm7 = vcmp.gt.f32.partialorder %v906_v5, 1.0  ;;  %v1037_v3 = vmul.f32 0.9, %v906_v5 }
 0x4e1   :  { %v1307_v58 = vsel %vm910_vm7, 1.0, %v1602_v0  ;;  %v1042_v7 = vadd.f32 %v1038_v62, %v936_v63 }
 0x4e2   :  { %933 = vst.msk [vmem:[#allocation10 + $0xd8] sm:$0xff] %vm50_vm0, %v909_v56  ;;  %v908_v59 = vadd.f32 %v1699_v22, %v904_v57  ;;  %923 = vst.msk [vmem:[#allocation9 + $0x50] sm:$0xff] %vm50_vm0, %v1307_v58  ;;  %1483 = vmatprep.mubr.msk.f32.mxu0 %vm50_vm0, %v1307_v58  ;;  %vm913_vm8 = vcmp.gt.f32.partialorder %v909_v56, 1.0  ;;  %v1040_v8 = vmul.f32 0.9, %v909_v56  ;;  %v1041_v12 = vadd.f32 %v1037_v3, %v935_v6 }
 0x4e3   :  { %1484 = vmatmul.mubr.msk.f32.vlgmr.msra.gmra.mxu0 %vm50_vm0, %v1308_v54  ;;  %v1310_v60 = vsel %vm913_vm8, 1.0, %v1602_v0 }
 0x4e4   :  { %932 = vst.msk [vmem:[#allocation10 + $0xd0] sm:$0xff] %vm50_vm0, %v908_v59  ;;  %vm912_vm9 = vcmp.gt.f32.partialorder %v908_v59, 1.0  ;;  %930 = vst.msk [vmem:[#allocation9 + $0xd8] sm:$0xff] %vm50_vm0, %v1310_v60  ;;  %v1039_v13 = vmul.f32 0.9, %v908_v59  ;;  %v1044_v18 = vadd.f32 %v1040_v8, %v939_v10 }
 0x4e5   :  { %v1309_v61 = vsel %vm912_vm9, 1.0, %v1602_v0 }
 0x4e6   :  { %929 = vst.msk [vmem:[#allocation9 + $0xd0] sm:$0xff] %vm50_vm0, %v1309_v61  ;;  %1486 = vmatprep.mubr.msk.f32.mxu0 %vm50_vm0, %v1309_v61  ;;  %v1043_v23 = vadd.f32 %v1039_v13, %v938_v15 }
 0x4e7   :  { %1487 = vmatmul.mubr.msk.f32.gmra.mxu0 %vm50_vm0, %v1310_v60 }
 0x5a3   :  { %v1485_v9 = vpop.f32.mrf.mxu0 }
 0x5a4   :  { %v1046_v11 = vadd.f32 %v1485_v9, %v1042_v7 }
 0x5a5   :  { %v1018_v14 = vpop.f32.mrf.mxu0 }
 0x5a6   :  { %v1050_v16 = vadd.f32 %v1699_v22, %v1046_v11  ;;  %v1045_v17 = vadd.f32 %v1041_v12, %v1018_v14 }
 0x5a7   :  { %v1488_v19 = vpop.f32.mrf.mxu0 }
 0x5a8   :  { %vm1054_vm10 = vcmp.gt.f32.partialorder %v1050_v16, 1.0  ;;  %1070 = vst.msk [vmem:[#allocation10 + $0x68] sm:$0xff] %vm50_vm0, %v1050_v16  ;;  %v1049_v20 = vadd.f32 %v1699_v22, %v1045_v17  ;;  %v1048_v21 = vadd.f32 %v1488_v19, %v1044_v18  ;;  %v1181_v32 = vmul.f32 0.9, %v1050_v16 }
 0x5a9   :  { %v1316_v24 = vsel %vm1054_vm10, 1.0, %v1602_v0  ;;  %v1028_v25 = vpop.f32.mrf.mxu0 }
 0x5aa   :  { %1067 = vst.msk [vmem:[#allocation9 + $0x68] sm:$0xff] %vm50_vm0, %v1316_v24  ;;  %1069 = vst.msk [vmem:[#allocation10 + $0x60] sm:$0xff] %vm50_vm0, %v1049_v20  ;;  %v1052_v26 = vadd.f32 %v1699_v22, %v1048_v21  ;;  %v1047_v27 = vadd.f32 %v1043_v23, %v1028_v25  ;;  %vm1053_vm11 = vcmp.gt.f32.partialorder %v1049_v20, 1.0  ;;  %v1180_v34 = vmul.f32 0.9, %v1049_v20 }
 0x5ab   :  { %v1315_v28 = vsel %vm1053_vm11, 1.0, %v1602_v0  ;;  %v1185_v36 = vadd.f32 %v1181_v32, %v1079_v33 }
 0x5ac   :  { %1076 = vst.msk [vmem:[#allocation10 + $0xe8] sm:$0xff] %vm50_vm0, %v1052_v26  ;;  %v1051_v29 = vadd.f32 %v1699_v22, %v1047_v27  ;;  %1066 = vst.msk [vmem:[#allocation9 + $0x60] sm:$0xff] %vm50_vm0, %v1315_v28  ;;  %1497 = vmatprep.mubr.msk.f32.mxu1 %vm50_vm0, %v1315_v28  ;;  %vm1056_vm12 = vcmp.gt.f32.partialorder %v1052_v26, 1.0  ;;  %v1183_v37 = vmul.f32 0.9, %v1052_v26  ;;  %v1184_v40 = vadd.f32 %v1180_v34, %v1078_v35 }
 0x5ad   :  { %1498 = vmatmul.mubr.msk.f32.vlgmr.msra.gmra.mxu1 %vm50_vm0, %v1316_v24  ;;  %v1318_v30 = vsel %vm1056_vm12, 1.0, %v1602_v0 }
 0x5ae   :  { %1075 = vst.msk [vmem:[#allocation10 + $0xe0] sm:$0xff] %vm50_vm0, %v1051_v29  ;;  %vm1055_vm13 = vcmp.gt.f32.partialorder %v1051_v29, 1.0  ;;  %1073 = vst.msk [vmem:[#allocation9 + $0xe8] sm:$0xff] %vm50_vm0, %v1318_v30  ;;  %v1182_v41 = vmul.f32 0.9, %v1051_v29  ;;  %v1187_v2 = vadd.f32 %v1183_v37, %v1082_v38 }
 0x5af   :  { %v1317_v31 = vsel %vm1055_vm13, 1.0, %v1602_v0 }
 0x5b0   :  { %1072 = vst.msk [vmem:[#allocation9 + $0xe0] sm:$0xff] %vm50_vm0, %v1317_v31  ;;  %1500 = vmatprep.mubr.msk.f32.mxu1 %vm50_vm0, %v1317_v31  ;;  %v1186_v49 = vadd.f32 %v1182_v41, %v1081_v43 }
 0x5b1   :  { %1501 = vmatmul.mubr.msk.f32.gmra.mxu1 %vm50_vm0, %v1318_v30 }
 0x66d   :  { %v1499_v1 = vpop.f32.mrf.mxu1 }
 0x66e   :  { %v1189_v39 = vadd.f32 %v1499_v1, %v1185_v36 }
 0x66f   :  { %v1161_v42 = vpop.f32.mrf.mxu1 }
 0x670   :  { %v1193_v44 = vadd.f32 %v1699_v22, %v1189_v39  ;;  %v1188_v45 = vadd.f32 %v1184_v40, %v1161_v42 }
 0x671   :  { %v1502_v46 = vpop.f32.mrf.mxu1 }
 0x672   :  { %vm1197_vm14 = vcmp.gt.f32.partialorder %v1193_v44, 1.0  ;;  %1213 = vst.msk [vmem:[#allocation10 + $0x78] sm:$0xff] %vm50_vm0, %v1193_v44  ;;  %1225 = vst.msk [vmem:[#allocation3 + $0x8] sm:$0xff] %vm50_vm0, %v1193_v44  ;;  %v1192_v47 = vadd.f32 %v1699_v22, %v1188_v45  ;;  %v1191_v48 = vadd.f32 %v1502_v46, %v1187_v2 }
 0x673   :  { %v1324_v4 = vsel %vm1197_vm14, 1.0, %v1602_v0  ;;  %v1171_v50 = vpop.f32.mrf.mxu1 }
 0x674   :  { %1210 = vst.msk [vmem:[#allocation9 + $0x78] sm:$0xff] %vm50_vm0, %v1324_v4  ;;  %1221 = vst.msk [vmem:[#allocation2 + $0x8] sm:$0xff] %vm50_vm0, %v1324_v4  ;;  %vm1196_vm15 = vcmp.gt.f32.partialorder %v1192_v47, 1.0  ;;  %v1195_v51 = vadd.f32 %v1699_v22, %v1191_v48  ;;  %v1190_v5 = vadd.f32 %v1186_v49, %v1171_v50 }
 0x675   :  { %1212 = vst.msk [vmem:[#allocation10 + $0x70] sm:$0xff] %vm50_vm0, %v1192_v47  ;;  %1224 = vst.msk [vmem:[#allocation3] sm:$0xff] %vm50_vm0, %v1192_v47  ;;  %v1323_v52 = vsel %vm1196_vm15, 1.0, %v1602_v0 }
 0x676   :  { %1209 = vst.msk [vmem:[#allocation9 + $0x70] sm:$0xff] %vm50_vm0, %v1323_v52  ;;  %1220 = vst.msk [vmem:[#allocation2] sm:$0xff] %vm50_vm0, %v1323_v52  ;;  %vm1199_vm1 = vcmp.gt.f32.partialorder %v1195_v51, 1.0  ;;  %v1194_v53 = vadd.f32 %v1699_v22, %v1190_v5 }
 0x677   :  { %1219 = vst.msk [vmem:[#allocation10 + $0xf8] sm:$0xff] %vm50_vm0, %v1195_v51  ;;  %1227 = vst.msk [vmem:[#allocation3 + $0x18] sm:$0xff] %vm50_vm0, %v1195_v51  ;;  %v1326_v54 = vsel %vm1199_vm1, 1.0, %v1602_v0 }
 0x678   :  { %1216 = vst.msk [vmem:[#allocation9 + $0xf8] sm:$0xff] %vm50_vm0, %v1326_v54  ;;  %1223 = vst.msk [vmem:[#allocation2 + $0x18] sm:$0xff] %vm50_vm0, %v1326_v54  ;;  %vm1198_vm2 = vcmp.gt.f32.partialorder %v1194_v53, 1.0 }
 0x679   :  { %1218 = vst.msk [vmem:[#allocation10 + $0xf0] sm:$0xff] %vm50_vm0, %v1194_v53  ;;  %1226 = vst.msk [vmem:[#allocation3 + $0x10] sm:$0xff] %vm50_vm0, %v1194_v53  ;;  %v1325_v55 = vsel %vm1198_vm2, 1.0, %v1602_v0 }
 0x67a   :  { %1561 = shalt.err (!%p1558_p0)
}
 0x67b   :  { %1251 = dma.vmem_to_hbm [thread:$0]  %s1246_s27, 4096, %s1919_s4, [#allocation11], %s1599_s18, %s1599_s18, %s1600_s19   ;;  %1215 = vst.msk [vmem:[#allocation9 + $0xf0] sm:$0xff] %vm50_vm0, %v1325_v55  ;;  %1222 = vst.msk [vmem:[#allocation2 + $0x10] sm:$0xff] %vm50_vm0, %v1325_v55 }
 0x67c   :  { %s1570_s7 = scalar_lea.vmem %s1234_s29, 4096  ;;  %p1575_p2 = scmp.lt.s32.totalorder %s1234_s29, %s1234_s29 }
 0x67d   :  { %p1571_p1 = scmp.ne.s32.totalorder %s1234_s29, %s1570_s7  ;;  %p1576_p3 = scmp.lt.s32.totalorder %s1570_s7, %s1570_s7 }
 0x67f   :  { %p1577_p4 = por %p1576_p3, %p1575_p2 }
 0x681   :  { %p1578_p5 = pnand %p1577_p4, %p1571_p1 }
 0x683   :  { %1581 = shalt.err (!%p1578_p5)
}
 0x684   :  { %1239 = dma.vmem_to_hbm [thread:$0]  %s1234_s29, 4096, %s1918_s3, [#allocation6], %s1599_s18, %s1599_s18, %s1600_s19  }
 0x685   :  { %1594 = dma.done.wait [#allocation6], 4096  }
 0x686   :  { %1595 = vsyncadd [#allocation6], 4294963200 }
 0x687   :  { %1596 = dma.done.wait [#allocation11], 4096  }
 0x688   :  { %1597 = vsyncadd [#allocation11], 4294963200 }
 0x689   :  { %1258 = vsyncpa [#allocation5], 1 }
 0x68a   :  { %1259 = vsyncpa [#allocation8], 1 }
 0x68b   :  { %1260 = vsyncpa [#allocation6], 1 }
 0x68c   :  { %1261 = vsyncpa [#allocation11], 1 }

</bundles_post_ra>
